<compile_context>
chip_gen: v7x
topology: tpu7x:2x2x1
jax: 0.10.0
libtpu: 0.0.40
codegen_flags: <defaults>
</compile_context>

<pallas_src>
import math

import jax
import jax.numpy as jnp
from jax.experimental import pallas as pl
from jax.experimental.pallas import tpu as pltpu

BN_EPS = 1e-5      # nn.BatchNorm1d default eps
F = 128            # padded (lane-dense) feature width
SUBLANE = 8        # f32 sublane count


# --------------------------------------------------------------------------
# Fused forward kernel (built per static network configuration / batch size)
# --------------------------------------------------------------------------
def _build_fused_kernel(enc_down, dec_down, n_real, b_pad):
    """enc_down / dec_down: tuple[bool] — does ResBlock i have a downsample?
    n_real: real batch size (static); b_pad: sublane-padded batch (static)."""
    n_enc, n_dec = len(enc_down), len(dec_down)
    inv_n = 1.0 / float(n_real)

    def kernel(x_ref, eps_ref, sbeta_ref, w_ref, v_ref, out_ref):
        # Row mask built in-kernel (no mask DMA): 1.0 for real rows else 0.0.
        row = jax.lax.broadcasted_iota(jnp.int32, (b_pad, F), 0)
        mask = (row < n_real).astype(jnp.float32)

        def resblock(h, li, bi, has_down):
            w = w_ref[li]                  # (F, 2F) bf16
            v = v_ref[li]                  # (8, F)  f32: b_fc, gamma, beta, b_dn
            hb = h.astype(jnp.bfloat16)
            if has_down:
                hs = jnp.dot(hb, w, preferred_element_type=jnp.float32)
                pre = hs[:, :F] + v[0, :]
                skip = hs[:, F:] + v[3, :]
            else:
                # Only push the real 128 weight columns through the MXU.
                pre = jnp.dot(hb, w[:, :F],
                              preferred_element_type=jnp.float32) + v[0, :]
                skip = h
            # BatchNorm1d, training mode: masked single-pass batch statistics.
            pm = pre * mask
            s1 = jnp.sum(pm, axis=0, keepdims=True)
            s2 = jnp.sum(pm * pre, axis=0, keepdims=True)
            mean = s1 * inv_n
            var = jnp.maximum(s2 * inv_n - mean * mean, 0.0)
            hbn = (pre - mean) * jax.lax.rsqrt(var + BN_EPS) * v[1, :] + v[2, :]
            act = hbn * jax.nn.sigmoid(sbeta_ref[bi] * hbn)   # Swish(beta)
            return act + skip

        h = x_ref[...]
        li = 0
        for b in range(n_enc):
            h = resblock(h, li, b, enc_down[b])
            li += 1

        # fused fc21 | fc22 head + reparameterization (eps supplied by caller)
        w_head = w_ref[li]
        v_head = v_ref[li]
        li += 1
        hh = jnp.dot(h.astype(jnp.bfloat16), w_head,
                     preferred_element_type=jnp.float32)
        mu = hh[:, :F] + v_head[0, :]
        logvar = hh[:, F:] + v_head[1, :]
        z = mu + eps_ref[...] * jnp.exp(0.5 * logvar)

        d = z
        for b in range(n_dec):
            d = resblock(d, li, n_enc + b, dec_down[b])
            li += 1

        w4 = w_ref[li]
        v4 = v_ref[li]
        recon = jnp.dot(d.astype(jnp.bfloat16), w4[:, :F],
                        preferred_element_type=jnp.float32) + v4[0, :]

        # single lane-dense output slab: [recon | mu | logvar]
        out_ref[:, 0:F] = recon
        out_ref[:, F:2 * F] = mu
        out_ref[:, 2 * F:3 * F] = logvar

    return kernel


# --------------------------------------------------------------------------
# Forward factory: hoists all per-call host work, returns a jitted forward.
# --------------------------------------------------------------------------
def build_forward(packed, batch, input_dim, z_dim):
    B_pad = ((batch + SUBLANE - 1) // SUBLANE) * SUBLANE
    kernel = _build_fused_kernel(packed["enc_down"], packed["dec_down"],
                                 batch, B_pad)
    w_all = packed["w_all"]              # (L, F, 2F) bf16
    v_all = packed["v_all"]              # (L, 8, F)  f32
    sbetas = packed["swish_betas"]       # (n_blocks,) f32

    vmem = pl.BlockSpec(memory_space=pltpu.MemorySpace.VMEM)
    smem = pl.BlockSpec(memory_space=pltpu.MemorySpace.SMEM)

    call = pl.pallas_call(
        kernel,
        out_shape=jax.ShapeDtypeStruct((B_pad, 3 * F), jnp.float32),
        in_specs=[vmem, vmem, smem, vmem, vmem],
        out_specs=vmem,
        compiler_params=pltpu.CompilerParams(vmem_limit_bytes=32 * 1024 * 1024),
    )

    @jax.jit
    def forward(x, eps):
        x_pad = jnp.zeros((B_pad, F), jnp.float32).at[:batch, :input_dim].set(x)
        eps_pad = jnp.zeros((B_pad, F), jnp.float32).at[:batch, :z_dim].set(eps)
        out = call(x_pad, eps_pad, sbetas, w_all, v_all)
        recon = out[:batch, :input_dim]
        mu = out[:batch, F:F + z_dim]
        logvar = out[:batch, 2 * F:2 * F + z_dim]
        return recon, mu, logvar

    return forward


# --------------------------------------------------------------------------
# Deterministic parameter initialization (mirrors PyTorch __init__)
# --------------------------------------------------------------------------
def _spectral_normalize(w, key, n_iter=5):
    """Divide (out, in) weight by its top singular value (power iteration)."""
    out_dim, _ = w.shape
    u = jax.random.normal(key, (out_dim,), jnp.float32)
    u = u / (jnp.linalg.norm(u) + 1e-12)
    v = None
    for _ in range(n_iter):
        v = w.T @ u
        v = v / (jnp.linalg.norm(v) + 1e-12)
        u = w @ v
        u = u / (jnp.linalg.norm(u) + 1e-12)
    sigma = u @ (w @ v)
    return w / sigma


def _kaiming_normal(key, out_dim, in_dim):
    gain = math.sqrt(2.0 / (1.0 + 0.01 ** 2))   # leaky_relu gain
    std = gain / math.sqrt(in_dim)
    return std * jax.random.normal(key, (out_dim, in_dim), jnp.float32)


def _xavier_normal(key, out_dim, in_dim):
    std = math.sqrt(2.0 / (in_dim + out_dim))
    return std * jax.random.normal(key, (out_dim, in_dim), jnp.float32)


def _linear_bias(key, out_dim, in_dim):
    bound = 1.0 / math.sqrt(in_dim)
    return jax.random.uniform(key, (out_dim,), jnp.float32, -bound, bound)


def _make_sn_linear(key, in_dim, out_dim, init):
    kw, ku, kb = jax.random.split(key, 3)
    w = (_kaiming_normal(kw, out_dim, in_dim) if init == "kaiming"
         else _xavier_normal(kw, out_dim, in_dim))
    w = _spectral_normalize(w, ku, n_iter=5)
    b = _linear_bias(kb, out_dim, in_dim)
    return {"w": jnp.asarray(w.T), "b": jnp.asarray(b)}   # w: (in, out), b: (out,)


def _make_resblock(key, in_dim, out_dim):
    kfc, kdn = jax.random.split(key, 2)
    fc = _make_sn_linear(kfc, in_dim, out_dim, init="kaiming")
    p = {
        "w_fc": fc["w"], "b_fc": fc["b"],
        "gamma": jnp.ones((out_dim,), jnp.float32),
        "beta": jnp.zeros((out_dim,), jnp.float32),
        "swish_beta": jnp.float32(1.0),
    }
    if in_dim != out_dim:
        dn = _make_sn_linear(kdn, in_dim, out_dim, init="kaiming")
        p["w_dn"], p["b_dn"] = dn["w"], dn["b"]
    return p


def init_params(key, input_dim, hidden_dim_layer0, enc_dims, dec_dims,
                hidden_dim_layer_out_Z, z_dim):
    keys = jax.random.split(key, len(enc_dims) - 1 + len(dec_dims) - 1 + 3)
    it = iter(keys)
    enc = [_make_resblock(next(it), enc_dims[i], enc_dims[i + 1])
           for i in range(len(enc_dims) - 1)]
    fc21 = _make_sn_linear(next(it), hidden_dim_layer_out_Z, z_dim, init="xavier")
    fc22 = _make_sn_linear(next(it), hidden_dim_layer_out_Z, z_dim, init="xavier")
    dec = [_make_resblock(next(it), dec_dims[i], dec_dims[i + 1])
           for i in range(len(dec_dims) - 1)]
    fc4 = _make_sn_linear(next(it), hidden_dim_layer0, input_dim, init="xavier")
    return {"enc": enc, "fc21": fc21, "fc22": fc22, "dec": dec, "fc4": fc4}


# --------------------------------------------------------------------------
# Pack parameters into the padded, fused kernel layout
#   w_all: (L, F, 2F) bf16   — [w_fc | w_dn] per ResBlock, [w21 | w22] head,
#                              [w4 | 0] for fc4
#   v_all: (L, 8, F)  f32    — rows: b_fc, gamma, beta, b_dn (ResBlock);
#                              b21, b22 (head); b4 (fc4)
# --------------------------------------------------------------------------
def pack_params(params):
    enc_down, dec_down, sbetas = [], [], []
    w_layers, v_layers = [], []

    def add_resblock(p):
        has_down = "w_dn" in p
        wl = jnp.zeros((F, 2 * F), jnp.float32)
        wl = wl.at[:p["w_fc"].shape[0], :p["w_fc"].shape[1]].set(p["w_fc"])
        vl = jnp.zeros((8, F), jnp.float32)
        vl = vl.at[0, :p["b_fc"].shape[0]].set(p["b_fc"])
        vl = vl.at[1, :p["gamma"].shape[0]].set(p["gamma"])
        vl = vl.at[2, :p["beta"].shape[0]].set(p["beta"])
        if has_down:
            wl = wl.at[:p["w_dn"].shape[0], F:F + p["w_dn"].shape[1]].set(p["w_dn"])
            vl = vl.at[3, :p["b_dn"].shape[0]].set(p["b_dn"])
        w_layers.append(wl)
        v_layers.append(vl)
        sbetas.append(p["swish_beta"])
        return has_down

    for blk in params["enc"]:
        enc_down.append(add_resblock(blk))

    # fused fc21 | fc22 head
    wl = jnp.zeros((F, 2 * F), jnp.float32)
    w21, w22 = params["fc21"]["w"], params["fc22"]["w"]
    wl = wl.at[:w21.shape[0], :w21.shape[1]].set(w21)
    wl = wl.at[:w22.shape[0], F:F + w22.shape[1]].set(w22)
    vl = jnp.zeros((8, F), jnp.float32)
    vl = vl.at[0, :params["fc21"]["b"].shape[0]].set(params["fc21"]["b"])
    vl = vl.at[1, :params["fc22"]["b"].shape[0]].set(params["fc22"]["b"])
    w_layers.append(wl)
    v_layers.append(vl)

    for blk in params["dec"]:
        dec_down.append(add_resblock(blk))

    # fc4
    wl = jnp.zeros((F, 2 * F), jnp.float32)
    w4 = params["fc4"]["w"]
    wl = wl.at[:w4.shape[0], :w4.shape[1]].set(w4)
    vl = jnp.zeros((8, F), jnp.float32)
    vl = vl.at[0, :params["fc4"]["b"].shape[0]].set(params["fc4"]["b"])
    w_layers.append(wl)
    v_layers.append(vl)

    return {
        "w_all": jnp.stack(w_layers).astype(jnp.bfloat16),
        "v_all": jnp.stack(v_layers).astype(jnp.float32),
        "swish_betas": jnp.stack(sbetas).astype(jnp.float32),
        "enc_down": tuple(enc_down),
        "dec_down": tuple(dec_down),
    }


# --------------------------------------------------------------------------
# Pure-JAX reference (same math: bf16 matmuls / f32 accumulate, unpadded)
# --------------------------------------------------------------------------
def _mm(a, w):
    return jnp.dot(a.astype(jnp.bfloat16), w.astype(jnp.bfloat16),
                   preferred_element_type=jnp.float32)


def _reference_forward(params, x, eps):
    def resblock(p, h):
        pre = _mm(h, p["w_fc"]) + p["b_fc"]
        mean = jnp.mean(pre, axis=0, keepdims=True)
        var = jnp.maximum(jnp.mean(pre * pre, axis=0, keepdims=True)
                          - mean * mean, 0.0)
        hbn = (pre - mean) * jax.lax.rsqrt(var + BN_EPS) * p["gamma"] + p["beta"]
        act = hbn * jax.nn.sigmoid(p["swish_beta"] * hbn)
        skip = _mm(h, p["w_dn"]) + p["b_dn"] if "w_dn" in p else h
        return act + skip

    h = x
    for blk in params["enc"]:
        h = resblock(blk, h)
    mu = _mm(h, params["fc21"]["w"]) + params["fc21"]["b"]
    logvar = _mm(h, params["fc22"]["w"]) + params["fc22"]["b"]
    z = mu + eps * jnp.exp(0.5 * logvar)
    d = z
    for blk in params["dec"]:
        d = resblock(blk, d)
    recon = _mm(d, params["fc4"]["w"]) + params["fc4"]["b"]
    return recon, mu, logvar


# --------------------------------------------------------------------------
if __name__ == "__main__":
    key = jax.random.PRNGKey(0)
    k_params, k_x, k_eps = jax.random.split(key, 3)

    # Small, consistent configuration:
    batch = 4
    input_dim = 16
    enc_dims = [16, 32, 32, 24]        # Encoder_layer_dims (32->32: no downsample)
    hidden_dim_layer_out_Z = 24
    z_dim = 8
    dec_dims = [8, 24, 32]             # Decoder_layer_dims
    hidden_dim_layer0 = 32

    params = init_params(k_params, input_dim, hidden_dim_layer0, enc_dims,
                         dec_dims, hidden_dim_layer_out_Z, z_dim)
    packed = pack_params(params)
    forward = build_forward(packed, batch, input_dim, z_dim)

    x = jax.random.normal(k_x, (batch, input_dim), jnp.float32)
    # eps for the reparameterization trick (randn_like(std)), drawn in glue code.
    eps = jax.random.normal(k_eps, (batch, z_dim), jnp.float32)

    recon, mu, logvar = forward(x, eps)
    jax.block_until_ready((recon, mu, logvar))

    assert recon.shape == (batch, input_dim)
    assert mu.shape == (batch, z_dim)
    assert logvar.shape == (batch, z_dim)

    r_ref, m_ref, lv_ref = _reference_forward(params, x, eps)
    assert jnp.allclose(recon, r_ref, atol=2e-3, rtol=2e-3)
    assert jnp.allclose(mu, m_ref, atol=2e-3, rtol=2e-3)
    assert jnp.allclose(logvar, lv_ref, atol=2e-3, rtol=2e-3)

    print("KERNEL_OK")
</pallas_src>

<mosaic_0001>
module attributes {stable_mosaic.version = 11 : i64} {
  func.func @kernel(%arg0: memref<8x128xf32, #tpu.memory_space<vmem>>, %arg1: memref<8x128xf32, #tpu.memory_space<vmem>>, %arg2: memref<5xf32, #tpu.memory_space<smem>>, %arg3: memref<7x128x256xbf16, #tpu.memory_space<vmem>>, %arg4: memref<7x8x128xf32, #tpu.memory_space<vmem>>, %arg5: memref<8x384xf32, #tpu.memory_space<vmem>>) attributes {dimension_semantics = [], scalar_prefetch = 0 : i64, scratch_operands = 0 : i64, tpu.core_type = #tpu.core_type<tc>} {
    %0 = tpu.iota {dimensions = array<i32: 0>} : vector<8x128xi32>
    %c4_i32 = arith.constant 4 : i32
    %1 = vector.broadcast %c4_i32 : i32 to vector<8x128xi32>
    %2 = arith.cmpi slt, %0, %1 : vector<8x128xi32>
    %3 = arith.extui %2 : vector<8x128xi1> to vector<8x128xi32>
    %4 = arith.sitofp %3 : vector<8x128xi32> to vector<8x128xf32>
    %c0 = arith.constant 0 : index
    %c0_0 = arith.constant 0 : index
    %5 = vector.load %arg0[%c0, %c0_0] : memref<8x128xf32, #tpu.memory_space<vmem>>, vector<8x128xf32>
    %c0_1 = arith.constant 0 : index
    %c0_2 = arith.constant 0 : index
    %c0_3 = arith.constant 0 : index
    %6 = vector.load %arg3[%c0_1, %c0_2, %c0_3] : memref<7x128x256xbf16, #tpu.memory_space<vmem>>, vector<1x128x256xbf16>
    %7 = vector.shape_cast %6 : vector<1x128x256xbf16> to vector<128x256xbf16>
    %c0_4 = arith.constant 0 : index
    %c0_5 = arith.constant 0 : index
    %c0_6 = arith.constant 0 : index
    %8 = vector.load %arg4[%c0_4, %c0_5, %c0_6] : memref<7x8x128xf32, #tpu.memory_space<vmem>>, vector<1x8x128xf32>
    %9 = vector.shape_cast %8 : vector<1x8x128xf32> to vector<8x128xf32>
    %10 = arith.truncf %5 : vector<8x128xf32> to vector<8x128xbf16>
    %cst = arith.constant dense<0.000000e+00> : vector<8x256xf32>
    %11 = tpu.matmul %10, %7, %cst {dimension_numbers = #tpu.dot_dimension_numbers<[1], [0], [0], [1], [0, 0, 1, 1], [], []>} : vector<8x128xbf16>, vector<128x256xbf16>, vector<8x256xf32> -> vector<8x256xf32>
    %12 = vector.extract_strided_slice %11 {offsets = [0, 0], sizes = [8, 128], strides = [1, 1]} : vector<8x256xf32> to vector<8x128xf32>
    %13 = vector.extract_strided_slice %9 {offsets = [0, 0], sizes = [1, 128], strides = [1, 1]} : vector<8x128xf32> to vector<1x128xf32>
    %14 = vector.shape_cast %13 : vector<1x128xf32> to vector<128xf32>
    %15 = vector.shape_cast %14 : vector<128xf32> to vector<1x128xf32>
    %16 = vector.broadcast %15 : vector<1x128xf32> to vector<8x128xf32>
    %17 = arith.addf %12, %16 : vector<8x128xf32>
    %18 = vector.extract_strided_slice %11 {offsets = [0, 128], sizes = [8, 128], strides = [1, 1]} : vector<8x256xf32> to vector<8x128xf32>
    %19 = vector.extract_strided_slice %9 {offsets = [3, 0], sizes = [1, 128], strides = [1, 1]} : vector<8x128xf32> to vector<1x128xf32>
    %20 = vector.shape_cast %19 : vector<1x128xf32> to vector<128xf32>
    %21 = vector.shape_cast %20 : vector<128xf32> to vector<1x128xf32>
    %22 = vector.broadcast %21 : vector<1x128xf32> to vector<8x128xf32>
    %23 = arith.addf %18, %22 : vector<8x128xf32>
    %24 = arith.mulf %17, %4 : vector<8x128xf32>
    %cst_7 = arith.constant dense<0.000000e+00> : vector<128xf32>
    %25 = vector.multi_reduction <add>, %24, %cst_7 [0] : vector<8x128xf32> to vector<128xf32>
    %26 = vector.shape_cast %25 : vector<128xf32> to vector<1x128xf32>
    %27 = arith.mulf %24, %17 : vector<8x128xf32>
    %cst_8 = arith.constant dense<0.000000e+00> : vector<128xf32>
    %28 = vector.multi_reduction <add>, %27, %cst_8 [0] : vector<8x128xf32> to vector<128xf32>
    %29 = vector.shape_cast %28 : vector<128xf32> to vector<1x128xf32>
    %cst_9 = arith.constant 2.500000e-01 : f32
    %30 = vector.broadcast %cst_9 : f32 to vector<1x128xf32>
    %31 = arith.mulf %26, %30 : vector<1x128xf32>
    %cst_10 = arith.constant 2.500000e-01 : f32
    %32 = vector.broadcast %cst_10 : f32 to vector<1x128xf32>
    %33 = arith.mulf %29, %32 : vector<1x128xf32>
    %34 = arith.mulf %31, %31 : vector<1x128xf32>
    %35 = arith.subf %33, %34 : vector<1x128xf32>
    %cst_11 = arith.constant 0.000000e+00 : f32
    %36 = vector.broadcast %cst_11 : f32 to vector<1x128xf32>
    %37 = arith.maximumf %35, %36 : vector<1x128xf32>
    %38 = vector.broadcast %31 : vector<1x128xf32> to vector<8x128xf32>
    %39 = arith.subf %17, %38 : vector<8x128xf32>
    %cst_12 = arith.constant 9.99999974E-6 : f32
    %40 = vector.broadcast %cst_12 : f32 to vector<1x128xf32>
    %41 = arith.addf %37, %40 : vector<1x128xf32>
    %42 = math.rsqrt %41 : vector<1x128xf32>
    %43 = vector.broadcast %42 : vector<1x128xf32> to vector<8x128xf32>
    %44 = arith.mulf %39, %43 : vector<8x128xf32>
    %45 = vector.extract_strided_slice %9 {offsets = [1, 0], sizes = [1, 128], strides = [1, 1]} : vector<8x128xf32> to vector<1x128xf32>
    %46 = vector.shape_cast %45 : vector<1x128xf32> to vector<128xf32>
    %47 = vector.shape_cast %46 : vector<128xf32> to vector<1x128xf32>
    %48 = vector.broadcast %47 : vector<1x128xf32> to vector<8x128xf32>
    %49 = arith.mulf %44, %48 : vector<8x128xf32>
    %50 = vector.extract_strided_slice %9 {offsets = [2, 0], sizes = [1, 128], strides = [1, 1]} : vector<8x128xf32> to vector<1x128xf32>
    %51 = vector.shape_cast %50 : vector<1x128xf32> to vector<128xf32>
    %52 = vector.shape_cast %51 : vector<128xf32> to vector<1x128xf32>
    %53 = vector.broadcast %52 : vector<1x128xf32> to vector<8x128xf32>
    %54 = arith.addf %49, %53 : vector<8x128xf32>
    %c0_13 = arith.constant 0 : index
    %55 = memref.load %arg2[%c0_13] : memref<5xf32, #tpu.memory_space<smem>>
    %56 = vector.broadcast %55 : f32 to vector<8x128xf32>
    %57 = arith.mulf %56, %54 : vector<8x128xf32>
    %58 = arith.negf %57 : vector<8x128xf32>
    %59 = math.exp %58 : vector<8x128xf32>
    %cst_14 = arith.constant 1.000000e+00 : f32
    %60 = vector.broadcast %cst_14 : f32 to vector<8x128xf32>
    %61 = arith.addf %60, %59 : vector<8x128xf32>
    %62 = arith.divf %60, %61 : vector<8x128xf32>
    %63 = arith.mulf %54, %62 : vector<8x128xf32>
    %64 = arith.addf %63, %23 : vector<8x128xf32>
    %c1 = arith.constant 1 : index
    %c0_15 = arith.constant 0 : index
    %c0_16 = arith.constant 0 : index
    %65 = vector.load %arg3[%c1, %c0_15, %c0_16] : memref<7x128x256xbf16, #tpu.memory_space<vmem>>, vector<1x128x256xbf16>
    %66 = vector.shape_cast %65 : vector<1x128x256xbf16> to vector<128x256xbf16>
    %c1_17 = arith.constant 1 : index
    %c0_18 = arith.constant 0 : index
    %c0_19 = arith.constant 0 : index
    %67 = vector.load %arg4[%c1_17, %c0_18, %c0_19] : memref<7x8x128xf32, #tpu.memory_space<vmem>>, vector<1x8x128xf32>
    %68 = vector.shape_cast %67 : vector<1x8x128xf32> to vector<8x128xf32>
    %69 = arith.truncf %64 : vector<8x128xf32> to vector<8x128xbf16>
    %70 = vector.extract_strided_slice %66 {offsets = [0, 0], sizes = [128, 128], strides = [1, 1]} : vector<128x256xbf16> to vector<128x128xbf16>
    %cst_20 = arith.constant dense<0.000000e+00> : vector<8x128xf32>
    %71 = tpu.matmul %69, %70, %cst_20 {dimension_numbers = #tpu.dot_dimension_numbers<[1], [0], [0], [1], [0, 0, 1, 1], [], []>} : vector<8x128xbf16>, vector<128x128xbf16>, vector<8x128xf32> -> vector<8x128xf32>
    %72 = vector.extract_strided_slice %68 {offsets = [0, 0], sizes = [1, 128], strides = [1, 1]} : vector<8x128xf32> to vector<1x128xf32>
    %73 = vector.shape_cast %72 : vector<1x128xf32> to vector<128xf32>
    %74 = vector.shape_cast %73 : vector<128xf32> to vector<1x128xf32>
    %75 = vector.broadcast %74 : vector<1x128xf32> to vector<8x128xf32>
    %76 = arith.addf %71, %75 : vector<8x128xf32>
    %77 = arith.mulf %76, %4 : vector<8x128xf32>
    %cst_21 = arith.constant dense<0.000000e+00> : vector<128xf32>
    %78 = vector.multi_reduction <add>, %77, %cst_21 [0] : vector<8x128xf32> to vector<128xf32>
    %79 = vector.shape_cast %78 : vector<128xf32> to vector<1x128xf32>
    %80 = arith.mulf %77, %76 : vector<8x128xf32>
    %cst_22 = arith.constant dense<0.000000e+00> : vector<128xf32>
    %81 = vector.multi_reduction <add>, %80, %cst_22 [0] : vector<8x128xf32> to vector<128xf32>
    %82 = vector.shape_cast %81 : vector<128xf32> to vector<1x128xf32>
    %cst_23 = arith.constant 2.500000e-01 : f32
    %83 = vector.broadcast %cst_23 : f32 to vector<1x128xf32>
    %84 = arith.mulf %79, %83 : vector<1x128xf32>
    %cst_24 = arith.constant 2.500000e-01 : f32
    %85 = vector.broadcast %cst_24 : f32 to vector<1x128xf32>
    %86 = arith.mulf %82, %85 : vector<1x128xf32>
    %87 = arith.mulf %84, %84 : vector<1x128xf32>
    %88 = arith.subf %86, %87 : vector<1x128xf32>
    %cst_25 = arith.constant 0.000000e+00 : f32
    %89 = vector.broadcast %cst_25 : f32 to vector<1x128xf32>
    %90 = arith.maximumf %88, %89 : vector<1x128xf32>
    %91 = vector.broadcast %84 : vector<1x128xf32> to vector<8x128xf32>
    %92 = arith.subf %76, %91 : vector<8x128xf32>
    %cst_26 = arith.constant 9.99999974E-6 : f32
    %93 = vector.broadcast %cst_26 : f32 to vector<1x128xf32>
    %94 = arith.addf %90, %93 : vector<1x128xf32>
    %95 = math.rsqrt %94 : vector<1x128xf32>
    %96 = vector.broadcast %95 : vector<1x128xf32> to vector<8x128xf32>
    %97 = arith.mulf %92, %96 : vector<8x128xf32>
    %98 = vector.extract_strided_slice %68 {offsets = [1, 0], sizes = [1, 128], strides = [1, 1]} : vector<8x128xf32> to vector<1x128xf32>
    %99 = vector.shape_cast %98 : vector<1x128xf32> to vector<128xf32>
    %100 = vector.shape_cast %99 : vector<128xf32> to vector<1x128xf32>
    %101 = vector.broadcast %100 : vector<1x128xf32> to vector<8x128xf32>
    %102 = arith.mulf %97, %101 : vector<8x128xf32>
    %103 = vector.extract_strided_slice %68 {offsets = [2, 0], sizes = [1, 128], strides = [1, 1]} : vector<8x128xf32> to vector<1x128xf32>
    %104 = vector.shape_cast %103 : vector<1x128xf32> to vector<128xf32>
    %105 = vector.shape_cast %104 : vector<128xf32> to vector<1x128xf32>
    %106 = vector.broadcast %105 : vector<1x128xf32> to vector<8x128xf32>
    %107 = arith.addf %102, %106 : vector<8x128xf32>
    %c1_27 = arith.constant 1 : index
    %108 = memref.load %arg2[%c1_27] : memref<5xf32, #tpu.memory_space<smem>>
    %109 = vector.broadcast %108 : f32 to vector<8x128xf32>
    %110 = arith.mulf %109, %107 : vector<8x128xf32>
    %111 = arith.negf %110 : vector<8x128xf32>
    %112 = math.exp %111 : vector<8x128xf32>
    %cst_28 = arith.constant 1.000000e+00 : f32
    %113 = vector.broadcast %cst_28 : f32 to vector<8x128xf32>
    %114 = arith.addf %113, %112 : vector<8x128xf32>
    %115 = arith.divf %113, %114 : vector<8x128xf32>
    %116 = arith.mulf %107, %115 : vector<8x128xf32>
    %117 = arith.addf %116, %64 : vector<8x128xf32>
    %c2 = arith.constant 2 : index
    %c0_29 = arith.constant 0 : index
    %c0_30 = arith.constant 0 : index
    %118 = vector.load %arg3[%c2, %c0_29, %c0_30] : memref<7x128x256xbf16, #tpu.memory_space<vmem>>, vector<1x128x256xbf16>
    %119 = vector.shape_cast %118 : vector<1x128x256xbf16> to vector<128x256xbf16>
    %c2_31 = arith.constant 2 : index
    %c0_32 = arith.constant 0 : index
    %c0_33 = arith.constant 0 : index
    %120 = vector.load %arg4[%c2_31, %c0_32, %c0_33] : memref<7x8x128xf32, #tpu.memory_space<vmem>>, vector<1x8x128xf32>
    %121 = vector.shape_cast %120 : vector<1x8x128xf32> to vector<8x128xf32>
    %122 = arith.truncf %117 : vector<8x128xf32> to vector<8x128xbf16>
    %cst_34 = arith.constant dense<0.000000e+00> : vector<8x256xf32>
    %123 = tpu.matmul %122, %119, %cst_34 {dimension_numbers = #tpu.dot_dimension_numbers<[1], [0], [0], [1], [0, 0, 1, 1], [], []>} : vector<8x128xbf16>, vector<128x256xbf16>, vector<8x256xf32> -> vector<8x256xf32>
    %124 = vector.extract_strided_slice %123 {offsets = [0, 0], sizes = [8, 128], strides = [1, 1]} : vector<8x256xf32> to vector<8x128xf32>
    %125 = vector.extract_strided_slice %121 {offsets = [0, 0], sizes = [1, 128], strides = [1, 1]} : vector<8x128xf32> to vector<1x128xf32>
    %126 = vector.shape_cast %125 : vector<1x128xf32> to vector<128xf32>
    %127 = vector.shape_cast %126 : vector<128xf32> to vector<1x128xf32>
    %128 = vector.broadcast %127 : vector<1x128xf32> to vector<8x128xf32>
    %129 = arith.addf %124, %128 : vector<8x128xf32>
    %130 = vector.extract_strided_slice %123 {offsets = [0, 128], sizes = [8, 128], strides = [1, 1]} : vector<8x256xf32> to vector<8x128xf32>
    %131 = vector.extract_strided_slice %121 {offsets = [3, 0], sizes = [1, 128], strides = [1, 1]} : vector<8x128xf32> to vector<1x128xf32>
    %132 = vector.shape_cast %131 : vector<1x128xf32> to vector<128xf32>
    %133 = vector.shape_cast %132 : vector<128xf32> to vector<1x128xf32>
    %134 = vector.broadcast %133 : vector<1x128xf32> to vector<8x128xf32>
    %135 = arith.addf %130, %134 : vector<8x128xf32>
    %136 = arith.mulf %129, %4 : vector<8x128xf32>
    %cst_35 = arith.constant dense<0.000000e+00> : vector<128xf32>
    %137 = vector.multi_reduction <add>, %136, %cst_35 [0] : vector<8x128xf32> to vector<128xf32>
    %138 = vector.shape_cast %137 : vector<128xf32> to vector<1x128xf32>
    %139 = arith.mulf %136, %129 : vector<8x128xf32>
    %cst_36 = arith.constant dense<0.000000e+00> : vector<128xf32>
    %140 = vector.multi_reduction <add>, %139, %cst_36 [0] : vector<8x128xf32> to vector<128xf32>
    %141 = vector.shape_cast %140 : vector<128xf32> to vector<1x128xf32>
    %cst_37 = arith.constant 2.500000e-01 : f32
    %142 = vector.broadcast %cst_37 : f32 to vector<1x128xf32>
    %143 = arith.mulf %138, %142 : vector<1x128xf32>
    %cst_38 = arith.constant 2.500000e-01 : f32
    %144 = vector.broadcast %cst_38 : f32 to vector<1x128xf32>
    %145 = arith.mulf %141, %144 : vector<1x128xf32>
    %146 = arith.mulf %143, %143 : vector<1x128xf32>
    %147 = arith.subf %145, %146 : vector<1x128xf32>
    %cst_39 = arith.constant 0.000000e+00 : f32
    %148 = vector.broadcast %cst_39 : f32 to vector<1x128xf32>
    %149 = arith.maximumf %147, %148 : vector<1x128xf32>
    %150 = vector.broadcast %143 : vector<1x128xf32> to vector<8x128xf32>
    %151 = arith.subf %129, %150 : vector<8x128xf32>
    %cst_40 = arith.constant 9.99999974E-6 : f32
    %152 = vector.broadcast %cst_40 : f32 to vector<1x128xf32>
    %153 = arith.addf %149, %152 : vector<1x128xf32>
    %154 = math.rsqrt %153 : vector<1x128xf32>
    %155 = vector.broadcast %154 : vector<1x128xf32> to vector<8x128xf32>
    %156 = arith.mulf %151, %155 : vector<8x128xf32>
    %157 = vector.extract_strided_slice %121 {offsets = [1, 0], sizes = [1, 128], strides = [1, 1]} : vector<8x128xf32> to vector<1x128xf32>
    %158 = vector.shape_cast %157 : vector<1x128xf32> to vector<128xf32>
    %159 = vector.shape_cast %158 : vector<128xf32> to vector<1x128xf32>
    %160 = vector.broadcast %159 : vector<1x128xf32> to vector<8x128xf32>
    %161 = arith.mulf %156, %160 : vector<8x128xf32>
    %162 = vector.extract_strided_slice %121 {offsets = [2, 0], sizes = [1, 128], strides = [1, 1]} : vector<8x128xf32> to vector<1x128xf32>
    %163 = vector.shape_cast %162 : vector<1x128xf32> to vector<128xf32>
    %164 = vector.shape_cast %163 : vector<128xf32> to vector<1x128xf32>
    %165 = vector.broadcast %164 : vector<1x128xf32> to vector<8x128xf32>
    %166 = arith.addf %161, %165 : vector<8x128xf32>
    %c2_41 = arith.constant 2 : index
    %167 = memref.load %arg2[%c2_41] : memref<5xf32, #tpu.memory_space<smem>>
    %168 = vector.broadcast %167 : f32 to vector<8x128xf32>
    %169 = arith.mulf %168, %166 : vector<8x128xf32>
    %170 = arith.negf %169 : vector<8x128xf32>
    %171 = math.exp %170 : vector<8x128xf32>
    %cst_42 = arith.constant 1.000000e+00 : f32
    %172 = vector.broadcast %cst_42 : f32 to vector<8x128xf32>
    %173 = arith.addf %172, %171 : vector<8x128xf32>
    %174 = arith.divf %172, %173 : vector<8x128xf32>
    %175 = arith.mulf %166, %174 : vector<8x128xf32>
    %176 = arith.addf %175, %135 : vector<8x128xf32>
    %c3 = arith.constant 3 : index
    %c0_43 = arith.constant 0 : index
    %c0_44 = arith.constant 0 : index
    %177 = vector.load %arg3[%c3, %c0_43, %c0_44] : memref<7x128x256xbf16, #tpu.memory_space<vmem>>, vector<1x128x256xbf16>
    %178 = vector.shape_cast %177 : vector<1x128x256xbf16> to vector<128x256xbf16>
    %c3_45 = arith.constant 3 : index
    %c0_46 = arith.constant 0 : index
    %c0_47 = arith.constant 0 : index
    %179 = vector.load %arg4[%c3_45, %c0_46, %c0_47] : memref<7x8x128xf32, #tpu.memory_space<vmem>>, vector<1x8x128xf32>
    %180 = vector.shape_cast %179 : vector<1x8x128xf32> to vector<8x128xf32>
    %181 = arith.truncf %176 : vector<8x128xf32> to vector<8x128xbf16>
    %cst_48 = arith.constant dense<0.000000e+00> : vector<8x256xf32>
    %182 = tpu.matmul %181, %178, %cst_48 {dimension_numbers = #tpu.dot_dimension_numbers<[1], [0], [0], [1], [0, 0, 1, 1], [], []>} : vector<8x128xbf16>, vector<128x256xbf16>, vector<8x256xf32> -> vector<8x256xf32>
    %183 = vector.extract_strided_slice %182 {offsets = [0, 0], sizes = [8, 128], strides = [1, 1]} : vector<8x256xf32> to vector<8x128xf32>
    %184 = vector.extract_strided_slice %180 {offsets = [0, 0], sizes = [1, 128], strides = [1, 1]} : vector<8x128xf32> to vector<1x128xf32>
    %185 = vector.shape_cast %184 : vector<1x128xf32> to vector<128xf32>
    %186 = vector.shape_cast %185 : vector<128xf32> to vector<1x128xf32>
    %187 = vector.broadcast %186 : vector<1x128xf32> to vector<8x128xf32>
    %188 = arith.addf %183, %187 : vector<8x128xf32>
    %189 = vector.extract_strided_slice %182 {offsets = [0, 128], sizes = [8, 128], strides = [1, 1]} : vector<8x256xf32> to vector<8x128xf32>
    %190 = vector.extract_strided_slice %180 {offsets = [1, 0], sizes = [1, 128], strides = [1, 1]} : vector<8x128xf32> to vector<1x128xf32>
    %191 = vector.shape_cast %190 : vector<1x128xf32> to vector<128xf32>
    %192 = vector.shape_cast %191 : vector<128xf32> to vector<1x128xf32>
    %193 = vector.broadcast %192 : vector<1x128xf32> to vector<8x128xf32>
    %194 = arith.addf %189, %193 : vector<8x128xf32>
    %c0_49 = arith.constant 0 : index
    %c0_50 = arith.constant 0 : index
    %195 = vector.load %arg1[%c0_49, %c0_50] : memref<8x128xf32, #tpu.memory_space<vmem>>, vector<8x128xf32>
    %cst_51 = arith.constant 5.000000e-01 : f32
    %196 = vector.broadcast %cst_51 : f32 to vector<8x128xf32>
    %197 = arith.mulf %196, %194 : vector<8x128xf32>
    %198 = math.exp %197 : vector<8x128xf32>
    %199 = arith.mulf %195, %198 : vector<8x128xf32>
    %200 = arith.addf %188, %199 : vector<8x128xf32>
    %c4 = arith.constant 4 : index
    %c0_52 = arith.constant 0 : index
    %c0_53 = arith.constant 0 : index
    %201 = vector.load %arg3[%c4, %c0_52, %c0_53] : memref<7x128x256xbf16, #tpu.memory_space<vmem>>, vector<1x128x256xbf16>
    %202 = vector.shape_cast %201 : vector<1x128x256xbf16> to vector<128x256xbf16>
    %c4_54 = arith.constant 4 : index
    %c0_55 = arith.constant 0 : index
    %c0_56 = arith.constant 0 : index
    %203 = vector.load %arg4[%c4_54, %c0_55, %c0_56] : memref<7x8x128xf32, #tpu.memory_space<vmem>>, vector<1x8x128xf32>
    %204 = vector.shape_cast %203 : vector<1x8x128xf32> to vector<8x128xf32>
    %205 = arith.truncf %200 : vector<8x128xf32> to vector<8x128xbf16>
    %cst_57 = arith.constant dense<0.000000e+00> : vector<8x256xf32>
    %206 = tpu.matmul %205, %202, %cst_57 {dimension_numbers = #tpu.dot_dimension_numbers<[1], [0], [0], [1], [0, 0, 1, 1], [], []>} : vector<8x128xbf16>, vector<128x256xbf16>, vector<8x256xf32> -> vector<8x256xf32>
    %207 = vector.extract_strided_slice %206 {offsets = [0, 0], sizes = [8, 128], strides = [1, 1]} : vector<8x256xf32> to vector<8x128xf32>
    %208 = vector.extract_strided_slice %204 {offsets = [0, 0], sizes = [1, 128], strides = [1, 1]} : vector<8x128xf32> to vector<1x128xf32>
    %209 = vector.shape_cast %208 : vector<1x128xf32> to vector<128xf32>
    %210 = vector.shape_cast %209 : vector<128xf32> to vector<1x128xf32>
    %211 = vector.broadcast %210 : vector<1x128xf32> to vector<8x128xf32>
    %212 = arith.addf %207, %211 : vector<8x128xf32>
    %213 = vector.extract_strided_slice %206 {offsets = [0, 128], sizes = [8, 128], strides = [1, 1]} : vector<8x256xf32> to vector<8x128xf32>
    %214 = vector.extract_strided_slice %204 {offsets = [3, 0], sizes = [1, 128], strides = [1, 1]} : vector<8x128xf32> to vector<1x128xf32>
    %215 = vector.shape_cast %214 : vector<1x128xf32> to vector<128xf32>
    %216 = vector.shape_cast %215 : vector<128xf32> to vector<1x128xf32>
    %217 = vector.broadcast %216 : vector<1x128xf32> to vector<8x128xf32>
    %218 = arith.addf %213, %217 : vector<8x128xf32>
    %219 = arith.mulf %212, %4 : vector<8x128xf32>
    %cst_58 = arith.constant dense<0.000000e+00> : vector<128xf32>
    %220 = vector.multi_reduction <add>, %219, %cst_58 [0] : vector<8x128xf32> to vector<128xf32>
    %221 = vector.shape_cast %220 : vector<128xf32> to vector<1x128xf32>
    %222 = arith.mulf %219, %212 : vector<8x128xf32>
    %cst_59 = arith.constant dense<0.000000e+00> : vector<128xf32>
    %223 = vector.multi_reduction <add>, %222, %cst_59 [0] : vector<8x128xf32> to vector<128xf32>
    %224 = vector.shape_cast %223 : vector<128xf32> to vector<1x128xf32>
    %cst_60 = arith.constant 2.500000e-01 : f32
    %225 = vector.broadcast %cst_60 : f32 to vector<1x128xf32>
    %226 = arith.mulf %221, %225 : vector<1x128xf32>
    %cst_61 = arith.constant 2.500000e-01 : f32
    %227 = vector.broadcast %cst_61 : f32 to vector<1x128xf32>
    %228 = arith.mulf %224, %227 : vector<1x128xf32>
    %229 = arith.mulf %226, %226 : vector<1x128xf32>
    %230 = arith.subf %228, %229 : vector<1x128xf32>
    %cst_62 = arith.constant 0.000000e+00 : f32
    %231 = vector.broadcast %cst_62 : f32 to vector<1x128xf32>
    %232 = arith.maximumf %230, %231 : vector<1x128xf32>
    %233 = vector.broadcast %226 : vector<1x128xf32> to vector<8x128xf32>
    %234 = arith.subf %212, %233 : vector<8x128xf32>
    %cst_63 = arith.constant 9.99999974E-6 : f32
    %235 = vector.broadcast %cst_63 : f32 to vector<1x128xf32>
    %236 = arith.addf %232, %235 : vector<1x128xf32>
    %237 = math.rsqrt %236 : vector<1x128xf32>
    %238 = vector.broadcast %237 : vector<1x128xf32> to vector<8x128xf32>
    %239 = arith.mulf %234, %238 : vector<8x128xf32>
    %240 = vector.extract_strided_slice %204 {offsets = [1, 0], sizes = [1, 128], strides = [1, 1]} : vector<8x128xf32> to vector<1x128xf32>
    %241 = vector.shape_cast %240 : vector<1x128xf32> to vector<128xf32>
    %242 = vector.shape_cast %241 : vector<128xf32> to vector<1x128xf32>
    %243 = vector.broadcast %242 : vector<1x128xf32> to vector<8x128xf32>
    %244 = arith.mulf %239, %243 : vector<8x128xf32>
    %245 = vector.extract_strided_slice %204 {offsets = [2, 0], sizes = [1, 128], strides = [1, 1]} : vector<8x128xf32> to vector<1x128xf32>
    %246 = vector.shape_cast %245 : vector<1x128xf32> to vector<128xf32>
    %247 = vector.shape_cast %246 : vector<128xf32> to vector<1x128xf32>
    %248 = vector.broadcast %247 : vector<1x128xf32> to vector<8x128xf32>
    %249 = arith.addf %244, %248 : vector<8x128xf32>
    %c3_64 = arith.constant 3 : index
    %250 = memref.load %arg2[%c3_64] : memref<5xf32, #tpu.memory_space<smem>>
    %251 = vector.broadcast %250 : f32 to vector<8x128xf32>
    %252 = arith.mulf %251, %249 : vector<8x128xf32>
    %253 = arith.negf %252 : vector<8x128xf32>
    %254 = math.exp %253 : vector<8x128xf32>
    %cst_65 = arith.constant 1.000000e+00 : f32
    %255 = vector.broadcast %cst_65 : f32 to vector<8x128xf32>
    %256 = arith.addf %255, %254 : vector<8x128xf32>
    %257 = arith.divf %255, %256 : vector<8x128xf32>
    %258 = arith.mulf %249, %257 : vector<8x128xf32>
    %259 = arith.addf %258, %218 : vector<8x128xf32>
    %c5 = arith.constant 5 : index
    %c0_66 = arith.constant 0 : index
    %c0_67 = arith.constant 0 : index
    %260 = vector.load %arg3[%c5, %c0_66, %c0_67] : memref<7x128x256xbf16, #tpu.memory_space<vmem>>, vector<1x128x256xbf16>
    %261 = vector.shape_cast %260 : vector<1x128x256xbf16> to vector<128x256xbf16>
    %c5_68 = arith.constant 5 : index
    %c0_69 = arith.constant 0 : index
    %c0_70 = arith.constant 0 : index
    %262 = vector.load %arg4[%c5_68, %c0_69, %c0_70] : memref<7x8x128xf32, #tpu.memory_space<vmem>>, vector<1x8x128xf32>
    %263 = vector.shape_cast %262 : vector<1x8x128xf32> to vector<8x128xf32>
    %264 = arith.truncf %259 : vector<8x128xf32> to vector<8x128xbf16>
    %cst_71 = arith.constant dense<0.000000e+00> : vector<8x256xf32>
    %265 = tpu.matmul %264, %261, %cst_71 {dimension_numbers = #tpu.dot_dimension_numbers<[1], [0], [0], [1], [0, 0, 1, 1], [], []>} : vector<8x128xbf16>, vector<128x256xbf16>, vector<8x256xf32> -> vector<8x256xf32>
    %266 = vector.extract_strided_slice %265 {offsets = [0, 0], sizes = [8, 128], strides = [1, 1]} : vector<8x256xf32> to vector<8x128xf32>
    %267 = vector.extract_strided_slice %263 {offsets = [0, 0], sizes = [1, 128], strides = [1, 1]} : vector<8x128xf32> to vector<1x128xf32>
    %268 = vector.shape_cast %267 : vector<1x128xf32> to vector<128xf32>
    %269 = vector.shape_cast %268 : vector<128xf32> to vector<1x128xf32>
    %270 = vector.broadcast %269 : vector<1x128xf32> to vector<8x128xf32>
    %271 = arith.addf %266, %270 : vector<8x128xf32>
    %272 = vector.extract_strided_slice %265 {offsets = [0, 128], sizes = [8, 128], strides = [1, 1]} : vector<8x256xf32> to vector<8x128xf32>
    %273 = vector.extract_strided_slice %263 {offsets = [3, 0], sizes = [1, 128], strides = [1, 1]} : vector<8x128xf32> to vector<1x128xf32>
    %274 = vector.shape_cast %273 : vector<1x128xf32> to vector<128xf32>
    %275 = vector.shape_cast %274 : vector<128xf32> to vector<1x128xf32>
    %276 = vector.broadcast %275 : vector<1x128xf32> to vector<8x128xf32>
    %277 = arith.addf %272, %276 : vector<8x128xf32>
    %278 = arith.mulf %271, %4 : vector<8x128xf32>
    %cst_72 = arith.constant dense<0.000000e+00> : vector<128xf32>
    %279 = vector.multi_reduction <add>, %278, %cst_72 [0] : vector<8x128xf32> to vector<128xf32>
    %280 = vector.shape_cast %279 : vector<128xf32> to vector<1x128xf32>
    %281 = arith.mulf %278, %271 : vector<8x128xf32>
    %cst_73 = arith.constant dense<0.000000e+00> : vector<128xf32>
    %282 = vector.multi_reduction <add>, %281, %cst_73 [0] : vector<8x128xf32> to vector<128xf32>
    %283 = vector.shape_cast %282 : vector<128xf32> to vector<1x128xf32>
    %cst_74 = arith.constant 2.500000e-01 : f32
    %284 = vector.broadcast %cst_74 : f32 to vector<1x128xf32>
    %285 = arith.mulf %280, %284 : vector<1x128xf32>
    %cst_75 = arith.constant 2.500000e-01 : f32
    %286 = vector.broadcast %cst_75 : f32 to vector<1x128xf32>
    %287 = arith.mulf %283, %286 : vector<1x128xf32>
    %288 = arith.mulf %285, %285 : vector<1x128xf32>
    %289 = arith.subf %287, %288 : vector<1x128xf32>
    %cst_76 = arith.constant 0.000000e+00 : f32
    %290 = vector.broadcast %cst_76 : f32 to vector<1x128xf32>
    %291 = arith.maximumf %289, %290 : vector<1x128xf32>
    %292 = vector.broadcast %285 : vector<1x128xf32> to vector<8x128xf32>
    %293 = arith.subf %271, %292 : vector<8x128xf32>
    %cst_77 = arith.constant 9.99999974E-6 : f32
    %294 = vector.broadcast %cst_77 : f32 to vector<1x128xf32>
    %295 = arith.addf %291, %294 : vector<1x128xf32>
    %296 = math.rsqrt %295 : vector<1x128xf32>
    %297 = vector.broadcast %296 : vector<1x128xf32> to vector<8x128xf32>
    %298 = arith.mulf %293, %297 : vector<8x128xf32>
    %299 = vector.extract_strided_slice %263 {offsets = [1, 0], sizes = [1, 128], strides = [1, 1]} : vector<8x128xf32> to vector<1x128xf32>
    %300 = vector.shape_cast %299 : vector<1x128xf32> to vector<128xf32>
    %301 = vector.shape_cast %300 : vector<128xf32> to vector<1x128xf32>
    %302 = vector.broadcast %301 : vector<1x128xf32> to vector<8x128xf32>
    %303 = arith.mulf %298, %302 : vector<8x128xf32>
    %304 = vector.extract_strided_slice %263 {offsets = [2, 0], sizes = [1, 128], strides = [1, 1]} : vector<8x128xf32> to vector<1x128xf32>
    %305 = vector.shape_cast %304 : vector<1x128xf32> to vector<128xf32>
    %306 = vector.shape_cast %305 : vector<128xf32> to vector<1x128xf32>
    %307 = vector.broadcast %306 : vector<1x128xf32> to vector<8x128xf32>
    %308 = arith.addf %303, %307 : vector<8x128xf32>
    %c4_78 = arith.constant 4 : index
    %309 = memref.load %arg2[%c4_78] : memref<5xf32, #tpu.memory_space<smem>>
    %310 = vector.broadcast %309 : f32 to vector<8x128xf32>
    %311 = arith.mulf %310, %308 : vector<8x128xf32>
    %312 = arith.negf %311 : vector<8x128xf32>
    %313 = math.exp %312 : vector<8x128xf32>
    %cst_79 = arith.constant 1.000000e+00 : f32
    %314 = vector.broadcast %cst_79 : f32 to vector<8x128xf32>
    %315 = arith.addf %314, %313 : vector<8x128xf32>
    %316 = arith.divf %314, %315 : vector<8x128xf32>
    %317 = arith.mulf %308, %316 : vector<8x128xf32>
    %318 = arith.addf %317, %277 : vector<8x128xf32>
    %c6 = arith.constant 6 : index
    %c0_80 = arith.constant 0 : index
    %c0_81 = arith.constant 0 : index
    %319 = vector.load %arg3[%c6, %c0_80, %c0_81] : memref<7x128x256xbf16, #tpu.memory_space<vmem>>, vector<1x128x256xbf16>
    %320 = vector.shape_cast %319 : vector<1x128x256xbf16> to vector<128x256xbf16>
    %c6_82 = arith.constant 6 : index
    %c0_83 = arith.constant 0 : index
    %c0_84 = arith.constant 0 : index
    %321 = vector.load %arg4[%c6_82, %c0_83, %c0_84] : memref<7x8x128xf32, #tpu.memory_space<vmem>>, vector<1x8x128xf32>
    %322 = vector.shape_cast %321 : vector<1x8x128xf32> to vector<8x128xf32>
    %323 = arith.truncf %318 : vector<8x128xf32> to vector<8x128xbf16>
    %324 = vector.extract_strided_slice %320 {offsets = [0, 0], sizes = [128, 128], strides = [1, 1]} : vector<128x256xbf16> to vector<128x128xbf16>
    %cst_85 = arith.constant dense<0.000000e+00> : vector<8x128xf32>
    %325 = tpu.matmul %323, %324, %cst_85 {dimension_numbers = #tpu.dot_dimension_numbers<[1], [0], [0], [1], [0, 0, 1, 1], [], []>} : vector<8x128xbf16>, vector<128x128xbf16>, vector<8x128xf32> -> vector<8x128xf32>
    %326 = vector.extract_strided_slice %322 {offsets = [0, 0], sizes = [1, 128], strides = [1, 1]} : vector<8x128xf32> to vector<1x128xf32>
    %327 = vector.shape_cast %326 : vector<1x128xf32> to vector<128xf32>
    %328 = vector.shape_cast %327 : vector<128xf32> to vector<1x128xf32>
    %329 = vector.broadcast %328 : vector<1x128xf32> to vector<8x128xf32>
    %330 = arith.addf %325, %329 : vector<8x128xf32>
    %c0_86 = arith.constant 0 : index
    %c0_87 = arith.constant 0 : index
    %331 = vector.load %arg5[%c0_86, %c0_87] : memref<8x384xf32, #tpu.memory_space<vmem>>, vector<8x128xf32>
    tpu.vector_store %arg5[%c0_86, %c0_87], %330 {strides = array<i32>} : memref<8x384xf32, #tpu.memory_space<vmem>>, vector<8x128xf32>,
    %c0_88 = arith.constant 0 : index
    %c128 = arith.constant 128 : index
    %332 = vector.load %arg5[%c0_88, %c128] : memref<8x384xf32, #tpu.memory_space<vmem>>, vector<8x128xf32>
    tpu.vector_store %arg5[%c0_88, %c128], %188 {strides = array<i32>} : memref<8x384xf32, #tpu.memory_space<vmem>>, vector<8x128xf32>,
    %c0_89 = arith.constant 0 : index
    %c256 = arith.constant 256 : index
    %333 = vector.load %arg5[%c0_89, %c256] : memref<8x384xf32, #tpu.memory_space<vmem>>, vector<8x128xf32>
    tpu.vector_store %arg5[%c0_89, %c256], %194 {strides = array<i32>} : memref<8x384xf32, #tpu.memory_space<vmem>>, vector<8x128xf32>,
    return
  }
}

</mosaic_0001>

<bundles_post_ra>
// kernel: forward.1
= control target key start
LH: loop header
LB: loop body
LE: loop exit
PB: predicated region body
PF: predicated region fallthrough
CT: control target
= control target key end

     0   :  { %10 = vsyncpa [#allocation3], 0  ;;  %s2132_s0 = inlined_call_operand.vmem [shape: f32[8,128], index: 0, kind: input, shape index: {}]   ;;  %s2133_s1 = inlined_call_operand.vmem [shape: f32[8,128], index: 1, kind: input, shape index: {}]   ;;  %s2134_s2 = inlined_call_operand.vmem [shape: f32[5], index: 2, kind: input, shape index: {}]   ;;  %s2135_s3 = inlined_call_operand.vmem [shape: bf16[7,128,256], index: 3, kind: input, shape index: {}]   ;;  %s2136_s4 = inlined_call_operand.vmem [shape: f32[7,8,128], index: 4, kind: input, shape index: {}]   ;;  %s2137_s5 = inlined_call_operand.vmem [shape: f32[8,384], index: 5, kind: output, shape index: {}]  }
   0x1   :  { %s21_s20 = sshll.u32 %s2134_s2, 4  ;;  %s22_s20 = int_to_ptr.vmem [resolvable:$true] %s21_s20 }
   0x2   :  { %s1689_s21 = scalar_lea.vmem %s22_s20, 16  ;;  %p1694_p1 = scmp.lt.s32.totalorder %s22_s20, %s22_s20 }
   0x3   :  { %p1690_p0 = scmp.ne.s32.totalorder %s22_s20, %s1689_s21  ;;  %p1695_p2 = scmp.lt.s32.totalorder %s1689_s21, %s1689_s21 }
   0x5   :  { %p1696_p3 = por %p1695_p2, %p1694_p1 }
   0x7   :  { %p1697_p4 = pnand %p1696_p3, %p1690_p0 }
   0x9   :  { %1700 = shalt.err (!%p1697_p4)
}
   0xa   :  { %s1703_s22 = smov [#allocation2]  }
   0xb   :  { %24 = dma.vmem_to_smem %s22_s20, 16, %s1703_s22, [#allocation3]  }
   0xc   :  { %1701 = dma.done.wait [#allocation3], 16  }
   0xd   :  { %1702 = vsyncadd [#allocation3], 4294967280 }
   0xe   :  { %32 = sfence }
   0xf   :  { %v1521_v0 = vld [vmem:[%s2135_s3 + $0x4] ss:$8 sps:$4 sm:$0xff]   ;;  %v1523_v1 = vld [vmem:[%s2135_s3] ss:$8 sps:$4 sm:$0xff]   ;;  %v1704_v2 = vmov 0   ;;  %v1705_v3 = vmov 0.0   ;;  %v34_v28 = vlaneseq }
  0x10   :  { %170 = vmatprep.mubr.bf16.mxu0 %v1704_v2  ;;  %1477 = vmatprep.subr.bf16.mxu1 %v1705_v3  ;;  %v1524_v4 = vld [vmem:[%s2135_s3 + $0x14] ss:$8 sps:$4 sm:$0xff]   ;;  %v1526_v5 = vld [vmem:[%s2135_s3 + $0x10] ss:$8 sps:$4 sm:$0xff]   ;;  %v1527_v6 = vld [vmem:[%s2135_s3 + $0x24] ss:$8 sps:$4 sm:$0xff]  }
  0x11   :  { %138 = vmatprep.subr.bf16.mxu0 %v1521_v0  ;;  %v1529_v7 = vld [vmem:[%s2135_s3 + $0x20] ss:$8 sps:$4 sm:$0xff]   ;;  %v1530_v8 = vld [vmem:[%s2135_s3 + $0x34] ss:$8 sps:$4 sm:$0xff]   ;;  %v1532_v9 = vld [vmem:[%s2135_s3 + $0x30] ss:$8 sps:$4 sm:$0xff]  }
  0x12   :  { %139 = vmatpush1.bf16.msra.mxu0 %v1523_v1  ;;  %v1533_v10 = vld [vmem:[%s2135_s3 + $0x44] ss:$8 sps:$4 sm:$0xff]   ;;  %v1535_v11 = vld [vmem:[%s2135_s3 + $0x40] ss:$8 sps:$4 sm:$0xff]   ;;  %v1536_v12 = vld [vmem:[%s2135_s3 + $0x54] ss:$8 sps:$4 sm:$0xff]  }
  0x13   :  { %140 = vmatprep.subr.bf16.mxu0 %v1524_v4  ;;  %v1538_v13 = vld [vmem:[%s2135_s3 + $0x50] ss:$8 sps:$4 sm:$0xff]   ;;  %v1539_v14 = vld [vmem:[%s2135_s3 + $0x64] ss:$8 sps:$4 sm:$0xff]   ;;  %v1541_v15 = vld [vmem:[%s2135_s3 + $0x60] ss:$8 sps:$4 sm:$0xff]  }
  0x14   :  { %v1542_v16 = vld [vmem:[%s2135_s3 + $0x74] ss:$8 sps:$4 sm:$0xff]   ;;  %v1544_v17 = vld [vmem:[%s2135_s3 + $0x70] ss:$8 sps:$4 sm:$0xff]   ;;  %v39_v18 = vld [vmem:[%s2132_s0] sm:$0xff]  ;;  %vm1706_vm0 = vmmov 0  }
  0x15   :  { %v57_v19 = vpack.c.bf16 %v39_v18, %v39_v18  ;;  %v1545_v20 = vld [vmem:[%s2135_s3 + $0x80] ss:$8 sps:$4 sm:$0xff]   ;;  %v1546_v21 = vld [vmem:[%s2135_s3 + $0x90] ss:$8 sps:$4 sm:$0xff]   ;;  %1493 = vmatprep.mubr.msk.bf16.mxu1 %vm1706_vm0, %v1705_v3  ;;  %v35_v29 = vshrl.u32 %v34_v28, 7  ;;  %s222_s22 = sld [smem:[#allocation2]] }
  0x16   :  { %141 = vmatpush1.bf16.msra.mxu0 %v1526_v5  ;;  %1478 = vmatpush3.bf16.msra.mxu1 %v1545_v20  ;;  %v1547_v22 = vld [vmem:[%s2135_s3 + $0xa0] ss:$8 sps:$4 sm:$0xff]   ;;  %v1548_v23 = vld [vmem:[%s2135_s3 + $0xb0] ss:$8 sps:$4 sm:$0xff]   ;;  %v1555_v18 = vld [vmem:[%s2135_s3 + $0x104] ss:$8 sps:$4 sm:$0xff]  }
  0x17   :  { %142 = vmatprep.subr.bf16.mxu0 %v1527_v6  ;;  %1479 = vmatprep.subr.bf16.mxu1 %v1705_v3  ;;  %v1549_v24 = vld [vmem:[%s2135_s3 + $0xc0] ss:$8 sps:$4 sm:$0xff]   ;;  %v1550_v25 = vld [vmem:[%s2135_s3 + $0xd0] ss:$8 sps:$4 sm:$0xff]   ;;  %v1827_v30 = vsub.s32 0, %v35_v29  ;;  %v1832_v32 = vsub.s32 3, %v35_v29 }
  0x18   :  { %v1551_v26 = vld [vmem:[%s2135_s3 + $0xe0] ss:$8 sps:$4 sm:$0xff]   ;;  %v1552_v27 = vld [vmem:[%s2135_s3 + $0xf0] ss:$8 sps:$4 sm:$0xff]   ;;  %vm36_vm1 = vcmp.lt.s32.totalorder %v35_v29, 4  ;;  %v1840_v62 = vsub.s32 1, %v35_v29 }
  0x19   :  { %v56_v31 = vld [vmem:[%s2136_s4] sm:$0xff]  ;;  %v1837_v35 = vsel %vm36_vm1, 1.0, %v1705_v3  ;;  %v1842_v63 = vsub.s32 2, %v35_v29  ;;  %v1558_v20 = vld [vmem:[%s2135_s3 + $0x114] ss:$8 sps:$4 sm:$0xff]   ;;  %s1294_s29 = sld [smem:[#allocation2 + $0x1]] }
  0x1a   :  { %143 = vmatpush1.bf16.msra.mxu0 %v1529_v7  ;;  %1480 = vmatpush3.bf16.msra.mxu1 %v1546_v21  ;;  %v182_v33 = vrot.slane %v56_v31, %v1827_v30  ;;  %v187_v34 = vrot.slane %v56_v31, %v1832_v32  ;;  %v215_v1 = vrot.slane %v56_v31, %v1840_v62  ;;  %v1556_v21 = vld [vmem:[%s2135_s3 + $0x110] ss:$8 sps:$4 sm:$0xff]   ;;  %v1570_v28 = vld [vmem:[%s2135_s3 + $0x154] ss:$8 sps:$4 sm:$0xff]   ;;  %s1329_s19 = sld [smem:[#allocation2 + $0x2]] }
  0x1b   :  { %144 = vmatprep.subr.bf16.mxu0 %v1530_v8  ;;  %1481 = vmatprep.subr.bf16.mxu1 %v1705_v3  ;;  %v220_v6 = vrot.slane %v56_v31, %v1842_v63  ;;  %v223_v8 = vstv %s222_s22  ;;  %v1568_v29 = vld [vmem:[%s2135_s3 + $0x150] ss:$8 sps:$4 sm:$0xff]   ;;  %v1573_v31 = vld [vmem:[%s2135_s3 + $0x164] ss:$8 sps:$4 sm:$0xff]  }
  0x1e   :  { %145 = vmatpush1.bf16.msra.mxu0 %v1532_v9  ;;  %1482 = vmatpush3.bf16.msra.mxu1 %v1547_v22  ;;  %v1561_v22 = vld [vmem:[%s2135_s3 + $0x124] ss:$8 sps:$4 sm:$0xff]  }
  0x1f   :  { %146 = vmatprep.subr.bf16.mxu0 %v1533_v10  ;;  %1483 = vmatprep.subr.bf16.mxu1 %v1705_v3 }
  0x22   :  { %147 = vmatpush1.bf16.msra.mxu0 %v1535_v11  ;;  %1484 = vmatpush3.bf16.msra.mxu1 %v1548_v23  ;;  %v1559_v23 = vld [vmem:[%s2135_s3 + $0x120] ss:$8 sps:$4 sm:$0xff]  }
  0x23   :  { %148 = vmatprep.subr.bf16.mxu0 %v1536_v12  ;;  %1485 = vmatprep.subr.bf16.mxu1 %v1705_v3 }
  0x26   :  { %149 = vmatpush1.bf16.msra.mxu0 %v1538_v13  ;;  %1486 = vmatpush3.bf16.msra.mxu1 %v1549_v24  ;;  %v1564_v24 = vld [vmem:[%s2135_s3 + $0x134] ss:$8 sps:$4 sm:$0xff]  }
  0x27   :  { %150 = vmatprep.subr.bf16.mxu0 %v1539_v14  ;;  %1487 = vmatprep.subr.bf16.mxu1 %v1705_v3 }
  0x2a   :  { %151 = vmatpush1.bf16.msra.mxu0 %v1541_v15  ;;  %1488 = vmatpush3.bf16.msra.mxu1 %v1550_v25  ;;  %v1562_v25 = vld [vmem:[%s2135_s3 + $0x130] ss:$8 sps:$4 sm:$0xff]  }
  0x2b   :  { %152 = vmatprep.subr.bf16.mxu0 %v1542_v16  ;;  %1489 = vmatprep.subr.bf16.mxu1 %v1705_v3 }
  0x2e   :  { %153 = vmatpush1.bf16.msra.mxu0 %v1544_v17  ;;  %1490 = vmatpush3.bf16.msra.mxu1 %v1551_v26  ;;  %v1567_v26 = vld [vmem:[%s2135_s3 + $0x144] ss:$8 sps:$4 sm:$0xff]  }
  0x2f   :  { %1491 = vmatprep.subr.bf16.mxu1 %v1705_v3  ;;  %489 = vmatprep.subr.bf16.mxu0 %v1555_v18 }
  0x31   :  { %171 = vmatmul.mubr.bf16.vlgmr.msra.gmra.mrb[0].mxu0 %v57_v19  ;;  %v1553_v19 = vld [vmem:[%s2135_s3 + $0x100] ss:$8 sps:$4 sm:$0xff]  }
  0x32   :  { %521 = vmatprep.mubr.bf16.mxu0 %v1704_v2  ;;  %1492 = vmatpush3.bf16.msra.mxu1 %v1552_v27  ;;  %v1565_v27 = vld [vmem:[%s2135_s3 + $0x140] ss:$8 sps:$4 sm:$0xff]  }
  0x33   :  { %490 = vmatpush1.bf16.msra.mxu0 %v1553_v19 }
  0x34   :  { %491 = vmatprep.subr.bf16.mxu0 %v1558_v20 }
  0x37   :  { %492 = vmatpush1.bf16.msra.mxu0 %v1556_v21  ;;  %v1579_v21 = vld [vmem:[%s2135_s3 + $0x184] ss:$8 sps:$4 sm:$0xff]  }
  0x38   :  { %493 = vmatprep.subr.bf16.mxu0 %v1561_v22  ;;  %v1577_v22 = vld [vmem:[%s2135_s3 + $0x180] ss:$8 sps:$4 sm:$0xff]   ;;  %684 = vmatprep.subr.bf16.mxu1 %v1579_v21 }
  0x3b   :  { %494 = vmatpush1.bf16.msra.mxu0 %v1559_v23  ;;  %v1582_v23 = vld [vmem:[%s2135_s3 + $0x194] ss:$8 sps:$4 sm:$0xff]  }
  0x3c   :  { %495 = vmatprep.subr.bf16.mxu0 %v1564_v24  ;;  %v1585_v24 = vld [vmem:[%s2135_s3 + $0x1a4] ss:$8 sps:$4 sm:$0xff]  }
  0x3f   :  { %496 = vmatpush1.bf16.msra.mxu0 %v1562_v25  ;;  %v1583_v25 = vld [vmem:[%s2135_s3 + $0x1a0] ss:$8 sps:$4 sm:$0xff]  }
  0x40   :  { %497 = vmatprep.subr.bf16.mxu0 %v1567_v26  ;;  %v1588_v26 = vld [vmem:[%s2135_s3 + $0x1b4] ss:$8 sps:$4 sm:$0xff]  }
  0x43   :  { %498 = vmatpush1.bf16.msra.mxu0 %v1565_v27  ;;  %v1586_v27 = vld [vmem:[%s2135_s3 + $0x1b0] ss:$8 sps:$4 sm:$0xff]  }
  0x44   :  { %499 = vmatprep.subr.bf16.mxu0 %v1570_v28  ;;  %v1591_v28 = vld [vmem:[%s2135_s3 + $0x1c4] ss:$8 sps:$4 sm:$0xff]  }
  0x47   :  { %500 = vmatpush1.bf16.msra.mxu0 %v1568_v29  ;;  %v1589_v29 = vld [vmem:[%s2135_s3 + $0x1c0] ss:$8 sps:$4 sm:$0xff]  }
  0x48   :  { %501 = vmatprep.subr.bf16.mxu0 %v1573_v31  ;;  %v1594_v31 = vld [vmem:[%s2135_s3 + $0x1d4] ss:$8 sps:$4 sm:$0xff]  }
 0x104   :  { %v172_v36 = vpop.f32.mrb[0].mxu0 }
 0x105   :  { %v183_v37 = vadd.f32 %v182_v33, %v172_v36  ;;  %v174_v38 = vpop.f32.mrb[1].mxu0  ;;  %v1571_v33 = vld [vmem:[%s2135_s3 + $0x160] ss:$8 sps:$4 sm:$0xff]   ;;  %v1574_v36 = vld [vmem:[%s2135_s3 + $0x170] ss:$8 sps:$4 sm:$0xff]  }
 0x106   :  { %v188_v39 = vadd.f32 %v187_v34, %v174_v38  ;;  %v176_v40 = vpop.f32.mrb[2].mxu0  ;;  %v1576_v34 = vld [vmem:[%s2135_s3 + $0x174] ss:$8 sps:$4 sm:$0xff]   ;;  %502 = vmatpush1.bf16.msra.mxu0 %v1571_v33  ;;  %v1592_v33 = vld [vmem:[%s2135_s3 + $0x1d0] ss:$8 sps:$4 sm:$0xff]  }
 0x107   :  { %v189_v41 = vmul.f32 %v1837_v35, %v183_v37  ;;  %v177_v42 = vpop.f32.mrb[3].mxu0  ;;  %503 = vmatprep.subr.bf16.mxu0 %v1576_v34  ;;  %v1597_v34 = vld [vmem:[%s2135_s3 + $0x1e4] ss:$8 sps:$4 sm:$0xff]  }
 0x109   :  { %v190_v43 = vrot.slane %v189_v41, 4  ;;  %v196_v44 = vmul.f32 %v189_v41, %v183_v37 }
 0x10a   :  { %504 = vmatpush1.bf16.msra.mxu0 %v1574_v36  ;;  %v1595_v36 = vld [vmem:[%s2135_s3 + $0x1e0] ss:$8 sps:$4 sm:$0xff]  }
 0x10b   :  { %v191_v45 = vadd.f32 %v190_v43, %v189_v41  ;;  %v197_v46 = vrot.slane %v196_v44, 4 }
 0x10d   :  { %v192_v47 = vrot.slane %v191_v45, 2  ;;  %v198_v48 = vadd.f32 %v197_v46, %v196_v44 }
 0x10f   :  { %v193_v49 = vadd.f32 %v192_v47, %v191_v45  ;;  %v199_v50 = vrot.slane %v198_v48, 2 }
 0x111   :  { %v194_v51 = vrot.slane %v193_v49, 1  ;;  %v200_v52 = vadd.f32 %v199_v50, %v198_v48 }
 0x113   :  { %v195_v53 = vadd.f32 %v194_v51, %v193_v49  ;;  %v201_v54 = vrot.slane %v200_v52, 1 }
 0x115   :  { %v202_v55 = vadd.f32 %v201_v54, %v200_v52  ;;  %v203_v56 = vmul.f32 0.25, %v195_v53 }
 0x117   :  { %v204_v57 = vmul.f32 0.25, %v202_v55  ;;  %v205_v58 = vmul.f32 %v203_v56, %v203_v56  ;;  %v208_v0 = vsub.f32 %v183_v37, %v203_v56  ;;  %v1285_v37 = vld [vmem:[%s2136_s4 + $0x8] sm:$0xff] }
 0x118   :  { %v256_v38 = vrot.slane %v1285_v37, %v1827_v30 }
 0x119   :  { %v206_v59 = vsub.f32 %v204_v57, %v205_v58 }
 0x11b   :  { %v207_v60 = vmax.f32 %v206_v59, 0.0 }
 0x11d   :  { %v209_v61 = vadd.f32 1e-05, %v207_v60 }
 0x11f   :  { %1657 = vrsqrt.f32 %v209_v61 }
 0x129   :  { %v1658_v4 = vpop.eup %1657 }
 0x12a   :  { %v211_v5 = vmul.f32 %v1658_v4, %v208_v0 }
 0x12c   :  { %v216_v7 = vmul.f32 %v215_v1, %v211_v5  ;;  %v371_v5 = vrot.slane %v1285_v37, %v1840_v62 }
 0x12e   :  { %v221_v9 = vadd.f32 %v220_v6, %v216_v7 }
 0x130   :  { %v224_v10 = vmul.f32 %v223_v8, %v221_v9  ;;  %v376_v8 = vrot.slane %v1285_v37, %v1842_v63  ;;  %v1600_v37 = vld [vmem:[%s2135_s3 + $0x1f4] ss:$8 sps:$4 sm:$0xff]  }
 0x132   :  { %v1268_v11 = vmul.f32 -1.442695, %v224_v10  ;;  %v379_v10 = vstv %s1294_s29  ;;  %s1397_s29 = sld [smem:[#allocation2 + $0x3]] }
 0x134   :  { %1659 = vpow2.f32 %v1268_v11 }
 0x13e   :  { %v1660_v12 = vpop.eup %1659 }
 0x13f   :  { %v228_v13 = vadd.f32 1.0, %v1660_v12 }
 0x141   :  { %1661 = vrcp.f32 %v228_v13 }
 0x14b   :  { %v1662_v14 = vpop.eup %1661 }
 0x14c   :  { %v231_v15 = vmul.f32 %v1662_v14, %v221_v9 }
 0x14e   :  { %v1846_v16 = vadd.f32 %v231_v15, %v188_v39 }
 0x150   :  { %v252_v17 = vpack.c.bf16 %v1846_v16, %v1846_v16 }
 0x152   :  { %1494 = vmatmul.mubr.bf16.vlgmr.msra.gmra.mrb[0].mxu1 %v252_v17 }
 0x153   :  { %716 = vmatprep.mubr.bf16.mxu1 %v1704_v2  ;;  %685 = vmatpush1.bf16.msra.mxu1 %v1577_v22 }
 0x154   :  { %686 = vmatprep.subr.bf16.mxu1 %v1582_v23 }
 0x225   :  { %v339_v39 = vpop.f32.mrb[0].mxu1 }
 0x226   :  { %v340_v40 = vadd.f32 %v339_v39, %v256_v38  ;;  %v1495_v41 = vpop.f32.mrb[1].mxu1  ;;  %v1598_v38 = vld [vmem:[%s2135_s3 + $0x1f0] ss:$8 sps:$4 sm:$0xff]   ;;  %v1601_v39 = vld [vmem:[%s2135_s3 + $0x200] ss:$8 sps:$4 sm:$0xff]  }
 0x227   :  { %v342_v42 = vpop.f32.mrb[2].mxu1  ;;  %v1606_v41 = vld [vmem:[%s2135_s3 + $0x214] ss:$8 sps:$4 sm:$0xff]  }
 0x228   :  { %v345_v43 = vmul.f32 %v1837_v35, %v340_v40  ;;  %v1496_v44 = vpop.f32.mrb[3].mxu1  ;;  %v1604_v42 = vld [vmem:[%s2135_s3 + $0x210] ss:$8 sps:$4 sm:$0xff]  }
 0x22a   :  { %v346_v45 = vrot.slane %v345_v43, 4  ;;  %v352_v46 = vmul.f32 %v345_v43, %v340_v40 }
 0x22c   :  { %v347_v47 = vadd.f32 %v346_v45, %v345_v43  ;;  %v353_v48 = vrot.slane %v352_v46, 4  ;;  %v1312_v43 = vld [vmem:[%s2136_s4 + $0x10] sm:$0xff] }
 0x22d   :  { %v533_v44 = vrot.slane %v1312_v43, %v1827_v30  ;;  %v538_v45 = vrot.slane %v1312_v43, %v1832_v32 }
 0x22e   :  { %v348_v49 = vrot.slane %v347_v47, 2  ;;  %v354_v50 = vadd.f32 %v353_v48, %v352_v46 }
 0x230   :  { %v349_v51 = vadd.f32 %v348_v49, %v347_v47  ;;  %v355_v52 = vrot.slane %v354_v50, 2 }
 0x232   :  { %v350_v53 = vrot.slane %v349_v51, 1  ;;  %v356_v54 = vadd.f32 %v355_v52, %v354_v50 }
 0x234   :  { %v351_v55 = vadd.f32 %v350_v53, %v349_v51  ;;  %v357_v56 = vrot.slane %v356_v54, 1 }
 0x236   :  { %v358_v57 = vadd.f32 %v357_v56, %v356_v54  ;;  %v359_v58 = vmul.f32 0.25, %v351_v55 }
 0x238   :  { %v360_v59 = vmul.f32 0.25, %v358_v57  ;;  %v361_v60 = vmul.f32 %v359_v58, %v359_v58  ;;  %v364_v4 = vsub.f32 %v340_v40, %v359_v58  ;;  %v1603_v40 = vld [vmem:[%s2135_s3 + $0x204] ss:$8 sps:$4 sm:$0xff]  }
 0x239   :  { %841 = vmatprep.subr.bf16.mxu0 %v1603_v40  ;;  %v1624_v40 = vld [vmem:[%s2135_s3 + $0x274] ss:$8 sps:$4 sm:$0xff]  }
 0x23a   :  { %v362_v61 = vsub.f32 %v360_v59, %v361_v60 }
 0x23c   :  { %v363_v0 = vmax.f32 %v362_v61, 0.0 }
 0x23e   :  { %v365_v1 = vadd.f32 1e-05, %v363_v0 }
 0x240   :  { %1663 = vrsqrt.f32 %v365_v1 }
 0x24a   :  { %v1664_v6 = vpop.eup %1663 }
 0x24b   :  { %v367_v7 = vmul.f32 %v1664_v6, %v364_v4 }
 0x24d   :  { %v372_v9 = vmul.f32 %v371_v5, %v367_v7 }
 0x24f   :  { %v377_v11 = vadd.f32 %v376_v8, %v372_v9 }
 0x251   :  { %v380_v12 = vmul.f32 %v379_v10, %v377_v11 }
 0x253   :  { %v1295_v13 = vmul.f32 -1.442695, %v380_v12 }
 0x255   :  { %1665 = vpow2.f32 %v1295_v13  ;;  %v566_v13 = vrot.slane %v1312_v43, %v1840_v62 }
 0x25f   :  { %v1666_v14 = vpop.eup %1665 }
 0x260   :  { %v384_v15 = vadd.f32 1.0, %v1666_v14 }
 0x262   :  { %1667 = vrcp.f32 %v384_v15 }
 0x26c   :  { %v1668_v17 = vpop.eup %1667 }
 0x26d   :  { %v387_v18 = vmul.f32 %v1668_v17, %v377_v11  ;;  %v571_v17 = vrot.slane %v1312_v43, %v1842_v63 }
 0x26f   :  { %v388_v19 = vadd.f32 %v387_v18, %v1846_v16  ;;  %v1580_v16 = vld [vmem:[%s2135_s3 + $0x190] ss:$8 sps:$4 sm:$0xff]  }
 0x270   :  { %687 = vmatpush1.bf16.msra.mxu1 %v1580_v16 }
 0x271   :  { %v408_v20 = vpack.c.bf16 %v388_v19, %v388_v19  ;;  %688 = vmatprep.subr.bf16.mxu1 %v1585_v24  ;;  %v574_v19 = vstv %s1329_s19 }
 0x273   :  { %522 = vmatmul.mubr.bf16.vlgmr.msra.gmra.mrb[4].mxu0 %v408_v20 }
 0x274   :  { %873 = vmatprep.mubr.bf16.mxu0 %v1704_v2  ;;  %689 = vmatpush1.bf16.msra.mxu1 %v1583_v25 }
 0x275   :  { %690 = vmatprep.subr.bf16.mxu1 %v1588_v26  ;;  %842 = vmatpush1.bf16.msra.mxu0 %v1601_v39  ;;  %v1619_v39 = vld [vmem:[%s2135_s3 + $0x260] ss:$8 sps:$4 sm:$0xff]  }
 0x276   :  { %843 = vmatprep.subr.bf16.mxu0 %v1606_v41  ;;  %v1622_v41 = vld [vmem:[%s2135_s3 + $0x270] ss:$8 sps:$4 sm:$0xff]  }
 0x278   :  { %691 = vmatpush1.bf16.msra.mxu1 %v1586_v27 }
 0x279   :  { %692 = vmatprep.subr.bf16.mxu1 %v1591_v28  ;;  %844 = vmatpush1.bf16.msra.mxu0 %v1604_v42  ;;  %v1609_v28 = vld [vmem:[%s2135_s3 + $0x224] ss:$8 sps:$4 sm:$0xff]   ;;  %v1347_v42 = vld [vmem:[%s2136_s4 + $0x18] sm:$0xff] }
 0x27a   :  { %845 = vmatprep.subr.bf16.mxu0 %v1609_v28  ;;  %v728_v43 = vrot.slane %v1347_v42, %v1827_v30 }
 0x27c   :  { %693 = vmatpush1.bf16.msra.mxu1 %v1589_v29  ;;  %v1607_v29 = vld [vmem:[%s2135_s3 + $0x220] ss:$8 sps:$4 sm:$0xff]  }
 0x27d   :  { %694 = vmatprep.subr.bf16.mxu1 %v1594_v31  ;;  %846 = vmatpush1.bf16.msra.mxu0 %v1607_v29  ;;  %v1612_v31 = vld [vmem:[%s2135_s3 + $0x234] ss:$8 sps:$4 sm:$0xff]  }
 0x27e   :  { %847 = vmatprep.subr.bf16.mxu0 %v1612_v31 }
 0x280   :  { %695 = vmatpush1.bf16.msra.mxu1 %v1592_v33  ;;  %v1610_v33 = vld [vmem:[%s2135_s3 + $0x230] ss:$8 sps:$4 sm:$0xff]  }
 0x281   :  { %696 = vmatprep.subr.bf16.mxu1 %v1597_v34  ;;  %848 = vmatpush1.bf16.msra.mxu0 %v1610_v33  ;;  %v1613_v34 = vld [vmem:[%s2135_s3 + $0x240] ss:$8 sps:$4 sm:$0xff]  }
 0x284   :  { %697 = vmatpush1.bf16.msra.mxu1 %v1595_v36  ;;  %v1618_v36 = vld [vmem:[%s2135_s3 + $0x254] ss:$8 sps:$4 sm:$0xff]  }
 0x285   :  { %698 = vmatprep.subr.bf16.mxu1 %v1600_v37  ;;  %v1616_v37 = vld [vmem:[%s2135_s3 + $0x250] ss:$8 sps:$4 sm:$0xff]  }
 0x288   :  { %699 = vmatpush1.bf16.msra.mxu1 %v1598_v38  ;;  %v1621_v38 = vld [vmem:[%s2135_s3 + $0x264] ss:$8 sps:$4 sm:$0xff]  }
 0x346   :  { %v523_v46 = vpop.f32.mrb[4].mxu0 }
 0x347   :  { %v534_v47 = vadd.f32 %v533_v44, %v523_v46  ;;  %v525_v48 = vpop.f32.mrb[5].mxu0  ;;  %v733_v44 = vrot.slane %v1347_v42, %v1840_v62 }
 0x348   :  { %v539_v49 = vadd.f32 %v538_v45, %v525_v48  ;;  %v527_v50 = vpop.f32.mrb[6].mxu0 }
 0x349   :  { %v540_v51 = vmul.f32 %v1837_v35, %v534_v47  ;;  %v528_v52 = vpop.f32.mrb[7].mxu0 }
 0x34b   :  { %v541_v53 = vrot.slane %v540_v51, 4  ;;  %v547_v54 = vmul.f32 %v540_v51, %v534_v47 }
 0x34d   :  { %v542_v55 = vadd.f32 %v541_v53, %v540_v51  ;;  %v548_v56 = vrot.slane %v547_v54, 4  ;;  %v735_v53 = vld [vmem:[%s2133_s1] sm:$0xff] }
 0x34f   :  { %v543_v57 = vrot.slane %v542_v55, 2  ;;  %v549_v58 = vadd.f32 %v548_v56, %v547_v54 }
 0x351   :  { %v544_v59 = vadd.f32 %v543_v57, %v542_v55  ;;  %v550_v60 = vrot.slane %v549_v58, 2 }
 0x353   :  { %v545_v61 = vrot.slane %v544_v59, 1  ;;  %v551_v0 = vadd.f32 %v550_v60, %v549_v58  ;;  %v1627_v58 = vld [vmem:[%s2135_s3 + $0x284] ss:$8 sps:$4 sm:$0xff]   ;;  %v1630_v60 = vld [vmem:[%s2135_s3 + $0x294] ss:$8 sps:$4 sm:$0xff]  }
 0x354   :  { %1036 = vmatprep.subr.bf16.mxu1 %v1627_v58 }
 0x355   :  { %v546_v1 = vadd.f32 %v545_v61, %v544_v59  ;;  %v552_v4 = vrot.slane %v551_v0, 1  ;;  %v1625_v59 = vld [vmem:[%s2135_s3 + $0x280] ss:$8 sps:$4 sm:$0xff]   ;;  %v1628_v61 = vld [vmem:[%s2135_s3 + $0x290] ss:$8 sps:$4 sm:$0xff]  }
 0x357   :  { %v553_v5 = vadd.f32 %v552_v4, %v551_v0  ;;  %v554_v6 = vmul.f32 0.25, %v546_v1  ;;  %v1633_v0 = vld [vmem:[%s2135_s3 + $0x2a4] ss:$8 sps:$4 sm:$0xff]   ;;  %v1631_v1 = vld [vmem:[%s2135_s3 + $0x2a0] ss:$8 sps:$4 sm:$0xff]  }
 0x358   :  { %v1636_v4 = vld [vmem:[%s2135_s3 + $0x2b4] ss:$8 sps:$4 sm:$0xff]  }
 0x359   :  { %v555_v7 = vmul.f32 0.25, %v553_v5  ;;  %v556_v8 = vmul.f32 %v554_v6, %v554_v6  ;;  %v559_v12 = vsub.f32 %v534_v47, %v554_v6  ;;  %v1634_v5 = vld [vmem:[%s2135_s3 + $0x2b0] ss:$8 sps:$4 sm:$0xff]   ;;  %v1639_v6 = vld [vmem:[%s2135_s3 + $0x2c4] ss:$8 sps:$4 sm:$0xff]  }
 0x35b   :  { %v557_v9 = vsub.f32 %v555_v7, %v556_v8  ;;  %v1637_v7 = vld [vmem:[%s2135_s3 + $0x2c0] ss:$8 sps:$4 sm:$0xff]   ;;  %v1642_v8 = vld [vmem:[%s2135_s3 + $0x2d4] ss:$8 sps:$4 sm:$0xff]  }
 0x35d   :  { %v558_v10 = vmax.f32 %v557_v9, 0.0  ;;  %v1640_v9 = vld [vmem:[%s2135_s3 + $0x2d0] ss:$8 sps:$4 sm:$0xff]  }
 0x35f   :  { %v560_v11 = vadd.f32 1e-05, %v558_v10  ;;  %v1645_v10 = vld [vmem:[%s2135_s3 + $0x2e4] ss:$8 sps:$4 sm:$0xff]  }
 0x361   :  { %1669 = vrsqrt.f32 %v560_v11  ;;  %v1643_v11 = vld [vmem:[%s2135_s3 + $0x2e0] ss:$8 sps:$4 sm:$0xff]  }
 0x36b   :  { %v1670_v14 = vpop.eup %1669 }
 0x36c   :  { %v562_v15 = vmul.f32 %v1670_v14, %v559_v12  ;;  %v1648_v12 = vld [vmem:[%s2135_s3 + $0x2f4] ss:$8 sps:$4 sm:$0xff]   ;;  %v1380_v14 = vld [vmem:[%s2136_s4 + $0x20] sm:$0xff] }
 0x36e   :  { %v567_v18 = vmul.f32 %v566_v13, %v562_v15  ;;  %v1646_v13 = vld [vmem:[%s2135_s3 + $0x2f0] ss:$8 sps:$4 sm:$0xff]   ;;  %v885_v15 = vrot.slane %v1380_v14, %v1827_v30 }
 0x370   :  { %v572_v20 = vadd.f32 %v571_v17, %v567_v18  ;;  %v890_v17 = vrot.slane %v1380_v14, %v1832_v32 }
 0x372   :  { %v575_v21 = vmul.f32 %v574_v19, %v572_v20 }
 0x374   :  { %v1330_v22 = vmul.f32 -1.442695, %v575_v21 }
 0x376   :  { %1671 = vpow2.f32 %v1330_v22 }
 0x380   :  { %v1672_v23 = vpop.eup %1671 }
 0x381   :  { %v579_v16 = vadd.f32 1.0, %v1672_v23 }
 0x383   :  { %1673 = vrcp.f32 %v579_v16 }
 0x38d   :  { %v1674_v24 = vpop.eup %1673 }
 0x38e   :  { %v582_v25 = vmul.f32 %v1674_v24, %v572_v20 }
 0x390   :  { %v583_v26 = vadd.f32 %v582_v25, %v539_v49 }
 0x392   :  { %v603_v27 = vpack.c.bf16 %v583_v26, %v583_v26 }
 0x394   :  { %717 = vmatmul.mubr.bf16.vlgmr.msra.gmra.mrb[4].mxu1 %v603_v27 }
 0x395   :  { %1068 = vmatprep.mubr.bf16.mxu1 %v1704_v2  ;;  %v1615_v2 = vld [vmem:[%s2135_s3 + $0x244] ss:$8 sps:$4 sm:$0xff]   ;;  %1037 = vmatpush1.bf16.msra.mxu1 %v1625_v59 }
 0x396   :  { %849 = vmatprep.subr.bf16.mxu0 %v1615_v2  ;;  %1038 = vmatprep.subr.bf16.mxu1 %v1630_v60 }
 0x397   :  { %850 = vmatpush1.bf16.msra.mxu0 %v1613_v34 }
 0x398   :  { %851 = vmatprep.subr.bf16.mxu0 %v1618_v36 }
 0x399   :  { %1039 = vmatpush1.bf16.msra.mxu1 %v1628_v61  ;;  %v1649_v61 = vld [vmem:[%s2135_s3 + $0x300] ss:$8 sps:$4 sm:$0xff]  }
 0x39a   :  { %1040 = vmatprep.subr.bf16.mxu1 %v1633_v0  ;;  %v1650_v0 = vld [vmem:[%s2135_s3 + $0x310] ss:$8 sps:$4 sm:$0xff]  }
 0x39b   :  { %852 = vmatpush1.bf16.msra.mxu0 %v1616_v37 }
 0x39c   :  { %853 = vmatprep.subr.bf16.mxu0 %v1621_v38 }
 0x39d   :  { %1041 = vmatpush1.bf16.msra.mxu1 %v1631_v1  ;;  %v1651_v1 = vld [vmem:[%s2135_s3 + $0x320] ss:$8 sps:$4 sm:$0xff]  }
 0x39e   :  { %1042 = vmatprep.subr.bf16.mxu1 %v1636_v4  ;;  %v1652_v4 = vld [vmem:[%s2135_s3 + $0x330] ss:$8 sps:$4 sm:$0xff]  }
 0x39f   :  { %854 = vmatpush1.bf16.msra.mxu0 %v1619_v39 }
 0x3a0   :  { %855 = vmatprep.subr.bf16.mxu0 %v1624_v40 }
 0x3a1   :  { %1043 = vmatpush1.bf16.msra.mxu1 %v1634_v5  ;;  %v1653_v5 = vld [vmem:[%s2135_s3 + $0x340] ss:$8 sps:$4 sm:$0xff]  }
 0x3a2   :  { %1044 = vmatprep.subr.bf16.mxu1 %v1639_v6  ;;  %v1654_v6 = vld [vmem:[%s2135_s3 + $0x350] ss:$8 sps:$4 sm:$0xff]  }
 0x3a3   :  { %856 = vmatpush1.bf16.msra.mxu0 %v1622_v41 }
 0x3a4   :  { %1497 = vmatprep.subr.bf16.mxu0 %v1705_v3 }
 0x3a5   :  { %1045 = vmatpush1.bf16.msra.mxu1 %v1637_v7  ;;  %v1655_v7 = vld [vmem:[%s2135_s3 + $0x360] ss:$8 sps:$4 sm:$0xff]  }
 0x3a6   :  { %1046 = vmatprep.subr.bf16.mxu1 %v1642_v8  ;;  %v1656_v8 = vld [vmem:[%s2135_s3 + $0x370] ss:$8 sps:$4 sm:$0xff]   ;;  %s1432_s3 = sld [smem:[#allocation2 + $0x4]] }
 0x3a9   :  { %1047 = vmatpush1.bf16.msra.mxu1 %v1640_v9  ;;  %v1415_v9 = vld [vmem:[%s2136_s4 + $0x28] sm:$0xff] }
 0x3aa   :  { %1048 = vmatprep.subr.bf16.mxu1 %v1645_v10  ;;  %v1080_v10 = vrot.slane %v1415_v9, %v1827_v30 }
 0x3ad   :  { %1049 = vmatpush1.bf16.msra.mxu1 %v1643_v11  ;;  %v1085_v11 = vrot.slane %v1415_v9, %v1832_v32 }
 0x3ae   :  { %1050 = vmatprep.subr.bf16.mxu1 %v1648_v12 }
 0x3b1   :  { %1051 = vmatpush1.bf16.msra.mxu1 %v1646_v13 }
 0x467   :  { %v718_v45 = vpop.f32.mrb[4].mxu1 }
 0x468   :  { %v729_v46 = vadd.f32 %v728_v43, %v718_v45  ;;  %v720_v47 = vpop.f32.mrb[5].mxu1 }
 0x469   :  { %v734_v48 = vadd.f32 %v733_v44, %v720_v47  ;;  %v722_v49 = vpop.f32.mrb[6].mxu1 }
 0x46a   :  { %1244 = vst [vmem:[%s2137_s5 + $0x8] sm:$0xff] %v729_v46  ;;  %v723_v50 = vpop.f32.mrb[7].mxu1  ;;  %v923_v49 = vrot.slane %v1380_v14, %v1842_v63 }
 0x46b   :  { %v736_v51 = vmul.f32 0.5, %v734_v48  ;;  %1245 = vst [vmem:[%s2137_s5 + $0x10] sm:$0xff] %v734_v48 }
 0x46d   :  { %v737_v52 = vmul.f32 1.442695, %v736_v51  ;;  %v926_v51 = vstv %s1397_s29 }
 0x46f   :  { %1675 = vpow2.f32 %v737_v52 }
 0x479   :  { %v1676_v54 = vpop.eup %1675 }
 0x47a   :  { %v739_v55 = vmul.f32 %v1676_v54, %v735_v53 }
 0x47c   :  { %v740_v56 = vadd.f32 %v739_v55, %v729_v46  ;;  %v918_v46 = vrot.slane %v1380_v14, %v1840_v62 }
 0x47e   :  { %v760_v57 = vpack.c.bf16 %v740_v56, %v740_v56 }
 0x480   :  { %874 = vmatmul.mubr.bf16.vlgmr.msra.gmra.mrb[8].mxu0 %v760_v57 }
 0x481   :  { %1513 = vmatprep.mubr.msk.bf16.mxu0 %vm1706_vm0, %v1705_v3  ;;  %1498 = vmatpush3.bf16.msra.mxu0 %v1649_v61 }
 0x482   :  { %1499 = vmatprep.subr.bf16.mxu0 %v1705_v3 }
 0x485   :  { %1500 = vmatpush3.bf16.msra.mxu0 %v1650_v0 }
 0x486   :  { %1501 = vmatprep.subr.bf16.mxu0 %v1705_v3 }
 0x489   :  { %1502 = vmatpush3.bf16.msra.mxu0 %v1651_v1 }
 0x48a   :  { %1503 = vmatprep.subr.bf16.mxu0 %v1705_v3 }
 0x48d   :  { %1504 = vmatpush3.bf16.msra.mxu0 %v1652_v4 }
 0x48e   :  { %1505 = vmatprep.subr.bf16.mxu0 %v1705_v3 }
 0x491   :  { %1506 = vmatpush3.bf16.msra.mxu0 %v1653_v5 }
 0x492   :  { %1507 = vmatprep.subr.bf16.mxu0 %v1705_v3 }
 0x495   :  { %1508 = vmatpush3.bf16.msra.mxu0 %v1654_v6 }
 0x496   :  { %1509 = vmatprep.subr.bf16.mxu0 %v1705_v3 }
 0x499   :  { %1510 = vmatpush3.bf16.msra.mxu0 %v1655_v7 }
 0x49a   :  { %1511 = vmatprep.subr.bf16.mxu0 %v1705_v3 }
 0x49d   :  { %1512 = vmatpush3.bf16.msra.mxu0 %v1656_v8 }
 0x553   :  { %v875_v18 = vpop.f32.mrb[8].mxu0 }
 0x554   :  { %v886_v19 = vadd.f32 %v885_v15, %v875_v18  ;;  %v877_v20 = vpop.f32.mrb[9].mxu0 }
 0x555   :  { %v891_v21 = vadd.f32 %v890_v17, %v877_v20  ;;  %v879_v22 = vpop.f32.mrb[10].mxu0 }
 0x556   :  { %v892_v23 = vmul.f32 %v1837_v35, %v886_v19  ;;  %v880_v16 = vpop.f32.mrb[11].mxu0 }
 0x558   :  { %v893_v24 = vrot.slane %v892_v23, 4  ;;  %v899_v25 = vmul.f32 %v892_v23, %v886_v19 }
 0x55a   :  { %v894_v26 = vadd.f32 %v893_v24, %v892_v23  ;;  %v900_v27 = vrot.slane %v899_v25, 4 }
 0x55c   :  { %v895_v28 = vrot.slane %v894_v26, 2  ;;  %v901_v29 = vadd.f32 %v900_v27, %v899_v25 }
 0x55e   :  { %v896_v31 = vadd.f32 %v895_v28, %v894_v26  ;;  %v902_v33 = vrot.slane %v901_v29, 2 }
 0x560   :  { %v897_v2 = vrot.slane %v896_v31, 1  ;;  %v903_v34 = vadd.f32 %v902_v33, %v901_v29 }
 0x562   :  { %v898_v36 = vadd.f32 %v897_v2, %v896_v31  ;;  %v904_v37 = vrot.slane %v903_v34, 1 }
 0x564   :  { %v905_v38 = vadd.f32 %v904_v37, %v903_v34  ;;  %v906_v39 = vmul.f32 0.25, %v898_v36 }
 0x566   :  { %v907_v40 = vmul.f32 0.25, %v905_v38  ;;  %v908_v41 = vmul.f32 %v906_v39, %v906_v39  ;;  %v911_v45 = vsub.f32 %v886_v19, %v906_v39  ;;  %v1113_v38 = vrot.slane %v1415_v9, %v1840_v62  ;;  %v1450_v62 = vld [vmem:[%s2136_s4 + $0x30] sm:$0xff] }
 0x568   :  { %v909_v42 = vsub.f32 %v907_v40, %v908_v41  ;;  %v1118_v41 = vrot.slane %v1415_v9, %v1842_v63  ;;  %v1154_v63 = vrot.slane %v1450_v62, %v1827_v30 }
 0x56a   :  { %v910_v43 = vmax.f32 %v909_v42, 0.0 }
 0x56c   :  { %v912_v44 = vadd.f32 1e-05, %v910_v43  ;;  %v1121_v43 = vstv %s1432_s3 }
 0x56e   :  { %1677 = vrsqrt.f32 %v912_v44 }
 0x578   :  { %v1678_v47 = vpop.eup %1677 }
 0x579   :  { %v914_v48 = vmul.f32 %v1678_v47, %v911_v45 }
 0x57b   :  { %v919_v50 = vmul.f32 %v918_v46, %v914_v48 }
 0x57d   :  { %v924_v52 = vadd.f32 %v923_v49, %v919_v50 }
 0x57f   :  { %v927_v53 = vmul.f32 %v926_v51, %v924_v52 }
 0x581   :  { %v1398_v54 = vmul.f32 -1.442695, %v927_v53 }
 0x583   :  { %1679 = vpow2.f32 %v1398_v54 }
 0x58d   :  { %v1680_v55 = vpop.eup %1679 }
 0x58e   :  { %v931_v56 = vadd.f32 1.0, %v1680_v55 }
 0x590   :  { %1681 = vrcp.f32 %v931_v56 }
 0x59a   :  { %v1682_v57 = vpop.eup %1681 }
 0x59b   :  { %v934_v58 = vmul.f32 %v1682_v57, %v924_v52 }
 0x59d   :  { %v935_v59 = vadd.f32 %v934_v58, %v891_v21 }
 0x59f   :  { %v955_v60 = vpack.c.bf16 %v935_v59, %v935_v59 }
 0x5a1   :  { %1069 = vmatmul.mubr.bf16.vlgmr.msra.gmra.mrb[8].mxu1 %v955_v60 }
 0x674   :  { %v1070_v12 = vpop.f32.mrb[8].mxu1 }
 0x675   :  { %v1081_v13 = vadd.f32 %v1080_v10, %v1070_v12  ;;  %v1072_v14 = vpop.f32.mrb[9].mxu1 }
 0x676   :  { %v1086_v15 = vadd.f32 %v1085_v11, %v1072_v14  ;;  %v1074_v17 = vpop.f32.mrb[10].mxu1 }
 0x677   :  { %v1087_v3 = vmul.f32 %v1837_v35, %v1081_v13  ;;  %v1075_v18 = vpop.f32.mrb[11].mxu1 }
 0x679   :  { %v1088_v19 = vrot.slane %v1087_v3, 4  ;;  %v1094_v20 = vmul.f32 %v1087_v3, %v1081_v13 }
 0x67b   :  { %v1089_v21 = vadd.f32 %v1088_v19, %v1087_v3  ;;  %v1095_v22 = vrot.slane %v1094_v20, 4 }
 0x67d   :  { %v1090_v23 = vrot.slane %v1089_v21, 2  ;;  %v1096_v16 = vadd.f32 %v1095_v22, %v1094_v20 }
 0x67f   :  { %v1091_v24 = vadd.f32 %v1090_v23, %v1089_v21  ;;  %v1097_v25 = vrot.slane %v1096_v16, 2 }
 0x681   :  { %v1092_v26 = vrot.slane %v1091_v24, 1  ;;  %v1098_v27 = vadd.f32 %v1097_v25, %v1096_v16 }
 0x683   :  { %v1093_v28 = vadd.f32 %v1092_v26, %v1091_v24  ;;  %v1099_v32 = vrot.slane %v1098_v27, 1 }
 0x685   :  { %v1100_v29 = vadd.f32 %v1099_v32, %v1098_v27  ;;  %v1101_v31 = vmul.f32 0.25, %v1093_v28 }
 0x687   :  { %v1102_v33 = vmul.f32 0.25, %v1100_v29  ;;  %v1103_v2 = vmul.f32 %v1101_v31, %v1101_v31  ;;  %v1106_v37 = vsub.f32 %v1081_v13, %v1101_v31 }
 0x689   :  { %v1104_v34 = vsub.f32 %v1102_v33, %v1103_v2 }
 0x68b   :  { %v1105_v36 = vmax.f32 %v1104_v34, 0.0 }
 0x68d   :  { %v1107_v35 = vadd.f32 1e-05, %v1105_v36 }
 0x68f   :  { %1683 = vrsqrt.f32 %v1107_v35 }
 0x699   :  { %v1684_v39 = vpop.eup %1683 }
 0x69a   :  { %v1109_v40 = vmul.f32 %v1684_v39, %v1106_v37 }
 0x69c   :  { %v1114_v42 = vmul.f32 %v1113_v38, %v1109_v40 }
 0x69e   :  { %v1119_v44 = vadd.f32 %v1118_v41, %v1114_v42 }
 0x6a0   :  { %v1122_v45 = vmul.f32 %v1121_v43, %v1119_v44 }
 0x6a2   :  { %v1433_v46 = vmul.f32 -1.442695, %v1122_v45 }
 0x6a4   :  { %1685 = vpow2.f32 %v1433_v46 }
 0x6ae   :  { %v1686_v47 = vpop.eup %1685 }
 0x6af   :  { %v1126_v48 = vadd.f32 1.0, %v1686_v47 }
 0x6b1   :  { %1687 = vrcp.f32 %v1126_v48 }
 0x6bb   :  { %v1688_v49 = vpop.eup %1687 }
 0x6bc   :  { %v1129_v50 = vmul.f32 %v1688_v49, %v1119_v44 }
 0x6be   :  { %v1130_v51 = vadd.f32 %v1129_v50, %v1086_v15 }
 0x6c0   :  { %v1150_v52 = vpack.c.bf16 %v1130_v51, %v1130_v51 }
 0x6c2   :  { %1514 = vmatmul.mubr.bf16.vlgmr.msra.gmra.mrb[12].mxu0 %v1150_v52 }
 0x795   :  { %v1237_v53 = vpop.f32.mrb[12].mxu0 }
 0x796   :  { %v1238_v54 = vadd.f32 %v1237_v53, %v1154_v63  ;;  %v1515_v55 = vpop.f32.mrb[13].mxu0 }
 0x797   :  { %v1240_v56 = vpop.f32.mrb[14].mxu0 }
 0x798   :  { %1243 = vst [vmem:[%s2137_s5] sm:$0xff] %v1238_v54  ;;  %v1516_v57 = vpop.f32.mrb[15].mxu0 }
 0x799   :  { %1250 = vsyncpa [#allocation3], 1 }

</bundles_post_ra>
